<compile_context>
chip_gen: v7x
topology: tpu7x:2x2x1
jax: 0.10.0
libtpu: 0.0.40
codegen_flags: <defaults>
</compile_context>

<pallas_src>
import functools

import jax
import jax.numpy as jnp
import numpy as np
from jax.experimental import pallas as pl
from jax.experimental.pallas import tpu as pltpu

K = 15                  # stem conv kernel size
P = K // 2              # 7 (conv padding)
HALO = 4                # polyphase taps shift by at most +-4 pooled positions
KC = 4 * K              # 60 im2col rows (taps x input channels)
KC_PAD = 64             # sublane-aligned contraction depth
BN_EPS = 1e-5


def stem_conv_kernel(ids_ref, w0_ref, b0_ref, y0_ref, stats_ref, *, halo):
    """Stem Conv1d(4->C, k=15, pad=7) on one (batch, tile) block, both pool phases fused."""
    H = halo
    ids = ids_ref[...]                                   # (2, T + 2H) int32; rows = even/odd phase
    W = ids.shape[1]
    T = W - 2 * H

    # --- one-hot encode both token phases (branch-free 'N' == 11 handling); compare in f32, store bf16
    ch = jax.lax.broadcasted_iota(jnp.int32, (4, W), 0)

    def one_hot(row):                                    # row: (1, W)
        cls = jnp.remainder(row - 7, 4)
        return jnp.where((ch == cls) & (row != 11), 1.0, 0.0).astype(jnp.bfloat16)

    x_e = one_hot(ids[0:1, :])                           # tokens at original positions 2g
    x_o = one_hot(ids[1:2, :])                           # tokens at original positions 2g + 1

    # --- 16 distinct (source-phase, shift) taps, memoized (both output phases share most of them)
    taps = {}

    def tap(name, src, d):                               # static lane-window slice; halo keeps it in-bounds
        if (name, d) not in taps:
            taps[(name, d)] = src[:, H + d:H + d + T]    # (4, T)
        return taps[(name, d)]

    rows_e, rows_o = [], []
    for k in range(K):
        # output position 2g + p reads input position 2g + p + k - 7 (zero outside the sequence)
        for p, rows in ((0, rows_e), (1, rows_o)):
            m = p + k - P
            if m % 2 == 0:
                rows.append(tap("e", x_e, m // 2))
            else:
                rows.append(tap("o", x_o, (m - 1) // 2))
    zpad = jnp.zeros((KC_PAD - KC, T), jnp.bfloat16)     # keep padded contraction rows exactly zero
    slab = jnp.concatenate(
        [jnp.concatenate(rows_e + [zpad], axis=0),
         jnp.concatenate(rows_o + [zpad], axis=0)], axis=1)          # (64, 2T) bf16 value (no scratch)

    # --- single fused MXU dot for both output phases; bias broadcast happens once on (C, 2T)
    y0 = jnp.dot(w0_ref[...], slab, preferred_element_type=jnp.float32) + b0_ref[...]

    y0_ref[0] = y0[:, :T].astype(jnp.bfloat16)           # even pool phase cache
    y0_ref[1] = y0[:, T:].astype(jnp.bfloat16)           # odd pool phase cache

    # --- single-pass BatchNorm partials (f32): per-tile sum / sum-of-squares, reduced in the wrapper
    stats_ref[...] = jnp.concatenate(
        [jnp.sum(y0, axis=1, keepdims=True),
         jnp.sum(y0 * y0, axis=1, keepdims=True)], axis=1)           # (C, 2)


def conv_block_kernel(y0_ref, scale_ref, shift_ref, w1_ref, b1_ref, out_ref):
    """Residual(BatchNorm -> GELU -> Conv1d(C, C, 1)) + MaxPool1d(2) on one (batch, tile) block."""
    y0c = y0_ref[...]                                                # (2, C, T) bf16 cache
    T = y0c.shape[2]
    y0 = jnp.concatenate([y0c[0], y0c[1]], axis=1).astype(jnp.float32)   # (C, 2T), phases fused

    xn = y0 * scale_ref[...] + shift_ref[...]                        # BN affine; one lane broadcast each
    # enformer sigmoid-GELU x * sigmoid(1.702 x): exp on the EUP + approx reciprocal (no VPU divide)
    g = xn * pl.reciprocal(1.0 + jnp.exp(-1.702 * xn), approx=True)
    y1 = jnp.dot(w1_ref[...], g.astype(jnp.bfloat16),
                 preferred_element_type=jnp.float32) + b1_ref[...]
    y1 = y1 + y0                                                     # Residual(ConvBlock)
    # MaxPool1d(pool_size=2): the pool pairs are exactly the two phases
    out_ref[...] = jnp.maximum(y1[:, :T], y1[:, T:]).astype(out_ref.dtype)


def make_params(key, c):
    k0, k1, k2, k3 = jax.random.split(key, 4)
    return dict(
        w0=jax.random.normal(k0, (c, 4, K), jnp.float32) * 0.1,     # stem Conv1d weight (out, in, k)
        b0=jax.random.normal(k1, (c,), jnp.float32) * 0.1,
        gamma=jnp.ones((c,), jnp.float32),                           # BatchNorm1d affine defaults
        beta=jnp.zeros((c,), jnp.float32),
        w1=jax.random.normal(k2, (c, c), jnp.float32) * 0.1,         # ConvBlock pointwise conv weight
        b1=jax.random.normal(k3, (c,), jnp.float32) * 0.1,
    )


def enformer_encoder_forward(x_ids, params, *, tile=512):
    """Pallas implementation of EnformerEncoder.forward (stem path). Returns ((B, L//2, C), True)."""
    B, L = x_ids.shape
    C = params["w0"].shape[0]
    assert L % 2 == 0
    Lh = L // 2
    T = min(tile, Lh)
    assert Lh % T == 0 and (T % 128 == 0 or T == Lh), "tile must divide L//2 and be lane-aligned"
    n_t = Lh // T
    Wt = T + 2 * HALO

    # --- cheap XLA-side plumbing ---------------------------------------------------------------
    # tokens split into even/odd pool phases; halo-pad with token 11 ('N' -> zero one-hot, which is
    # exactly the stem conv's zero padding); gather overlapping per-tile windows (halo = 4 each side).
    ids_eo = jnp.transpose(x_ids.astype(jnp.int32).reshape(B, Lh, 2), (0, 2, 1))      # (B, 2, Lh)
    ids_pad = jnp.pad(ids_eo, ((0, 0), (0, 0), (HALO, HALO)), constant_values=11)     # (B, 2, Lh+8)
    win = jnp.arange(n_t)[:, None] * T + jnp.arange(Wt)[None, :]                      # (n_t, Wt)
    ids_tiles = jnp.transpose(ids_pad[:, :, win], (0, 2, 1, 3))                       # (B, n_t, 2, Wt)

    # stem weight repacked to im2col layout: column 4k+i = w0[c, i, k]; MXU operands in bf16
    w0 = jnp.transpose(params["w0"], (0, 2, 1)).reshape(C, KC)
    w0 = jnp.pad(w0, ((0, 0), (0, KC_PAD - KC))).astype(jnp.bfloat16)
    b0 = params["b0"].reshape(C, 1)
    w1 = params["w1"].astype(jnp.bfloat16)
    b1 = params["b1"].reshape(C, 1)

    cparams = pltpu.CompilerParams(
        dimension_semantics=("parallel", "parallel"),    # batch x tiles; lets v7x use both TCs
        vmem_limit_bytes=32 * 1024 * 1024)               # explicit scoped-VMEM budget (v5e default 16 MiB)

    # --- pass 1: stem conv -> bf16 y0 cache + per-tile BatchNorm (sum, sumsq) partials ----------
    y0_cache, stats = pl.pallas_call(
        functools.partial(stem_conv_kernel, halo=HALO),
        grid=(B, n_t),
        in_specs=[
            pl.BlockSpec((None, None, 2, Wt), lambda b, t: (b, t, 0, 0)),
            pl.BlockSpec((C, KC_PAD), lambda b, t: (0, 0)),
            pl.BlockSpec((C, 1), lambda b, t: (0, 0)),
        ],
        out_specs=(
            pl.BlockSpec((None, 2, C, T), lambda b, t: (b, 0, 0, t)),
            pl.BlockSpec((None, None, C, 2), lambda b, t: (b, t, 0, 0)),
        ),
        out_shape=(
            jax.ShapeDtypeStruct((B, 2, C, Lh), jnp.bfloat16),       # y0 cache (re-read by pass 2)
            jax.ShapeDtypeStruct((B, n_t, C, 2), jnp.float32),       # per-tile (sum, sumsq)
        ),
        compiler_params=cparams,
    )(ids_tiles, w0, b0)

    # --- finish BatchNorm stats (tiny) and fold gamma/beta into scale/shift ---------------------
    sums = jnp.sum(stats, axis=(0, 1))                               # (C, 2)
    n = float(B * L)
    mean = sums[:, 0:1] / n
    var = jnp.maximum(sums[:, 1:2] / n - mean * mean, 0.0)
    scale = params["gamma"].reshape(C, 1) * jax.lax.rsqrt(var + BN_EPS)
    shift = params["beta"].reshape(C, 1) - mean * scale

    # --- pass 2: BN -> GELU -> pointwise conv -> residual -> maxpool, lane-dense bf16 output ----
    out = pl.pallas_call(
        conv_block_kernel,
        grid=(B, n_t),
        in_specs=[
            pl.BlockSpec((None, 2, C, T), lambda b, t: (b, 0, 0, t)),
            pl.BlockSpec((C, 1), lambda b, t: (0, 0)),
            pl.BlockSpec((C, 1), lambda b, t: (0, 0)),
            pl.BlockSpec((C, C), lambda b, t: (0, 0)),
            pl.BlockSpec((C, 1), lambda b, t: (0, 0)),
        ],
        out_specs=pl.BlockSpec((None, C, T), lambda b, t: (b, 0, t)),
        out_shape=jax.ShapeDtypeStruct((B, C, Lh), jnp.bfloat16),
        compiler_params=cparams,
    )(y0_cache, scale, shift, w1, b1)

    # (B, C, L//2) -> (B, L//2, C), matching x.transpose(1, 2); kept in bf16 to halve transpose traffic.
    return jnp.transpose(out, (0, 2, 1)), True


def enformer_encoder_reference(x_ids, params):
    """Pure-JAX (f32) reference of the same forward pass, for verification."""
    B, L = x_ids.shape
    w0, b0 = params["w0"], params["b0"]
    gamma, beta = params["gamma"], params["beta"]
    w1, b1 = params["w1"], params["b1"]
    C = w0.shape[0]

    cls = jnp.mod(x_ids - 7, 4)
    oh = jax.nn.one_hot(cls, 4, dtype=jnp.float32) * (x_ids != 11)[..., None]
    x = jnp.transpose(oh, (0, 2, 1))                                    # (B, 4, L)

    y0 = jax.lax.conv_general_dilated(
        x, w0, window_strides=(1,), padding=[(P, P)],
        dimension_numbers=("NCH", "OIH", "NCH")) + b0[None, :, None]

    mean = jnp.mean(y0, axis=(0, 2), keepdims=True)
    var = jnp.mean((y0 - mean) ** 2, axis=(0, 2), keepdims=True)
    xn = (y0 - mean) / jnp.sqrt(var + BN_EPS) * gamma[None, :, None] + beta[None, :, None]
    g = xn * jax.nn.sigmoid(1.702 * xn)
    y1 = jnp.einsum("oc,bcl->bol", w1, g) + b1[None, :, None] + y0
    out = jnp.max(y1.reshape(B, C, L // 2, 2), axis=-1)
    return jnp.transpose(out, (0, 2, 1)), True


if __name__ == "__main__":
    key = jax.random.PRNGKey(0)
    kx, kp = jax.random.split(key)

    # small-but-tiled config: half_dim == d_model when conv_tower=False, so C = d_model
    B, L, d_model = 2, 2048, 32
    C = d_model
    x_ids = jax.random.randint(kx, (B, L), 7, 12, dtype=jnp.int32)   # tokens in {7..11}; 11 == 'N'
    params = make_params(kp, C)

    y, flag = enformer_encoder_forward(x_ids, params, tile=512)      # grid = (2 batches, 2 tiles)
    y = jax.block_until_ready(y)

    y_ref, _ = enformer_encoder_reference(x_ids, params)
    assert y.shape == (B, L // 2, C) and flag is True
    # tolerance accounts for the bf16 y0 cache, bf16 MXU operands and bf16 output vs f32 reference
    np.testing.assert_allclose(np.asarray(y.astype(jnp.float32)), np.asarray(y_ref),
                               atol=4e-2, rtol=4e-2)
    print("KERNEL_OK")
</pallas_src>

<mosaic_0001>
module attributes {stable_mosaic.version = 11 : i64} {
  func.func @stem_conv_kernel(%arg0: i32, %arg1: i32, %arg2: memref<1x1x2x520xi32, #tpu.memory_space<vmem>>, %arg3: memref<32x64xbf16, #tpu.memory_space<vmem>>, %arg4: memref<32x1xf32, #tpu.memory_space<vmem>>, %arg5: memref<1x2x32x512xbf16, #tpu.memory_space<vmem>>, %arg6: memref<1x1x32x2xf32, #tpu.memory_space<vmem>>) attributes {dimension_semantics = [#tpu.dimension_semantics<parallel>, #tpu.dimension_semantics<parallel>], iteration_bounds = array<i64: 2, 2>, scalar_prefetch = 0 : i64, scratch_operands = 0 : i64, tpu.core_type = #tpu.core_type<tc>, window_params = [{transform_indices = @transform_0, window_bounds = array<i64: 1, 1, 2, 520>}, {pipeline_mode = #tpu.pipeline_mode<synchronous>, transform_indices = @transform_1, window_bounds = array<i64: 32, 64>}, {pipeline_mode = #tpu.pipeline_mode<synchronous>, transform_indices = @transform_2, window_bounds = array<i64: 32, 1>}, {transform_indices = @transform_3, window_bounds = array<i64: 1, 2, 32, 512>}, {transform_indices = @transform_4, window_bounds = array<i64: 1, 1, 32, 2>}]} {
    %c0 = arith.constant 0 : index
    %c0_0 = arith.constant 0 : index
    %c0_1 = arith.constant 0 : index
    %c0_2 = arith.constant 0 : index
    %0 = vector.load %arg2[%c0, %c0_0, %c0_1, %c0_2] : memref<1x1x2x520xi32, #tpu.memory_space<vmem>>, vector<1x1x2x520xi32>
    %1 = vector.shape_cast %0 : vector<1x1x2x520xi32> to vector<2x520xi32>
    %2 = tpu.iota {dimensions = array<i32: 0>} : vector<4x520xi32>
    %3 = vector.extract_strided_slice %1 {offsets = [0, 0], sizes = [1, 520], strides = [1, 1]} : vector<2x520xi32> to vector<1x520xi32>
    %c7_i32 = arith.constant 7 : i32
    %4 = vector.broadcast %c7_i32 : i32 to vector<1x520xi32>
    %5 = arith.subi %3, %4 : vector<1x520xi32>
    %c4_i32 = arith.constant 4 : i32
    %c0_i32 = arith.constant 0 : i32
    %6 = arith.cmpi eq, %c4_i32, %c0_i32 : i32
    %c1_i32 = arith.constant 1 : i32
    %7 = arith.select %6, %c1_i32, %c4_i32 : i32
    %8 = vector.broadcast %7 : i32 to vector<1x520xi32>
    %9 = arith.remsi %5, %8 : vector<1x520xi32>
    %c0_i32_3 = arith.constant 0 : i32
    %10 = vector.broadcast %c0_i32_3 : i32 to vector<1x520xi32>
    %11 = arith.cmpi ne, %9, %10 : vector<1x520xi32>
    %c0_i32_4 = arith.constant 0 : i32
    %12 = vector.broadcast %c0_i32_4 : i32 to vector<1x520xi32>
    %13 = arith.cmpi slt, %9, %12 : vector<1x520xi32>
    %c0_i32_5 = arith.constant 0 : i32
    %14 = arith.cmpi slt, %7, %c0_i32_5 : i32
    %15 = vector.broadcast %14 : i1 to vector<1x520xi1>
    %16 = vector.broadcast %15 : vector<1x520xi1> to vector<1x520xi1>
    %17 = arith.xori %13, %16 : vector<1x520xi1>
    %18 = arith.andi %17, %11 : vector<1x520xi1>
    %19 = vector.broadcast %7 : i32 to vector<1x520xi32>
    %20 = arith.addi %9, %19 : vector<1x520xi32>
    %21 = arith.select %18, %20, %9 : vector<1x520xi1>, vector<1x520xi32>
    %22 = vector.broadcast %21 : vector<1x520xi32> to vector<4x520xi32>
    %23 = arith.cmpi eq, %2, %22 : vector<4x520xi32>
    %c11_i32 = arith.constant 11 : i32
    %24 = vector.broadcast %c11_i32 : i32 to vector<1x520xi32>
    %25 = arith.cmpi ne, %3, %24 : vector<1x520xi32>
    %26 = vector.broadcast %25 : vector<1x520xi1> to vector<4x520xi1>
    %27 = arith.andi %23, %26 : vector<4x520xi1>
    %cst = arith.constant 1.000000e+00 : f32
    %cst_6 = arith.constant 0.000000e+00 : f32
    %28 = vector.broadcast %cst : f32 to vector<4x520xf32>
    %29 = vector.broadcast %cst_6 : f32 to vector<4x520xf32>
    %30 = arith.select %27, %28, %29 : vector<4x520xi1>, vector<4x520xf32>
    %31 = arith.truncf %30 : vector<4x520xf32> to vector<4x520xbf16>
    %32 = vector.extract_strided_slice %1 {offsets = [1, 0], sizes = [1, 520], strides = [1, 1]} : vector<2x520xi32> to vector<1x520xi32>
    %c7_i32_7 = arith.constant 7 : i32
    %33 = vector.broadcast %c7_i32_7 : i32 to vector<1x520xi32>
    %34 = arith.subi %32, %33 : vector<1x520xi32>
    %c4_i32_8 = arith.constant 4 : i32
    %c0_i32_9 = arith.constant 0 : i32
    %35 = arith.cmpi eq, %c4_i32_8, %c0_i32_9 : i32
    %c1_i32_10 = arith.constant 1 : i32
    %36 = arith.select %35, %c1_i32_10, %c4_i32_8 : i32
    %37 = vector.broadcast %36 : i32 to vector<1x520xi32>
    %38 = arith.remsi %34, %37 : vector<1x520xi32>
    %c0_i32_11 = arith.constant 0 : i32
    %39 = vector.broadcast %c0_i32_11 : i32 to vector<1x520xi32>
    %40 = arith.cmpi ne, %38, %39 : vector<1x520xi32>
    %c0_i32_12 = arith.constant 0 : i32
    %41 = vector.broadcast %c0_i32_12 : i32 to vector<1x520xi32>
    %42 = arith.cmpi slt, %38, %41 : vector<1x520xi32>
    %c0_i32_13 = arith.constant 0 : i32
    %43 = arith.cmpi slt, %36, %c0_i32_13 : i32
    %44 = vector.broadcast %43 : i1 to vector<1x520xi1>
    %45 = vector.broadcast %44 : vector<1x520xi1> to vector<1x520xi1>
    %46 = arith.xori %42, %45 : vector<1x520xi1>
    %47 = arith.andi %46, %40 : vector<1x520xi1>
    %48 = vector.broadcast %36 : i32 to vector<1x520xi32>
    %49 = arith.addi %38, %48 : vector<1x520xi32>
    %50 = arith.select %47, %49, %38 : vector<1x520xi1>, vector<1x520xi32>
    %51 = vector.broadcast %50 : vector<1x520xi32> to vector<4x520xi32>
    %52 = arith.cmpi eq, %2, %51 : vector<4x520xi32>
    %c11_i32_14 = arith.constant 11 : i32
    %53 = vector.broadcast %c11_i32_14 : i32 to vector<1x520xi32>
    %54 = arith.cmpi ne, %32, %53 : vector<1x520xi32>
    %55 = vector.broadcast %54 : vector<1x520xi1> to vector<4x520xi1>
    %56 = arith.andi %52, %55 : vector<4x520xi1>
    %cst_15 = arith.constant 1.000000e+00 : f32
    %cst_16 = arith.constant 0.000000e+00 : f32
    %57 = vector.broadcast %cst_15 : f32 to vector<4x520xf32>
    %58 = vector.broadcast %cst_16 : f32 to vector<4x520xf32>
    %59 = arith.select %56, %57, %58 : vector<4x520xi1>, vector<4x520xf32>
    %60 = arith.truncf %59 : vector<4x520xf32> to vector<4x520xbf16>
    %61 = vector.extract_strided_slice %60 {offsets = [0, 0], sizes = [4, 512], strides = [1, 1]} : vector<4x520xbf16> to vector<4x512xbf16>
    %62 = vector.extract_strided_slice %31 {offsets = [0, 1], sizes = [4, 512], strides = [1, 1]} : vector<4x520xbf16> to vector<4x512xbf16>
    %63 = vector.extract_strided_slice %60 {offsets = [0, 1], sizes = [4, 512], strides = [1, 1]} : vector<4x520xbf16> to vector<4x512xbf16>
    %64 = vector.extract_strided_slice %31 {offsets = [0, 2], sizes = [4, 512], strides = [1, 1]} : vector<4x520xbf16> to vector<4x512xbf16>
    %65 = vector.extract_strided_slice %60 {offsets = [0, 2], sizes = [4, 512], strides = [1, 1]} : vector<4x520xbf16> to vector<4x512xbf16>
    %66 = vector.extract_strided_slice %31 {offsets = [0, 3], sizes = [4, 512], strides = [1, 1]} : vector<4x520xbf16> to vector<4x512xbf16>
    %67 = vector.extract_strided_slice %60 {offsets = [0, 3], sizes = [4, 512], strides = [1, 1]} : vector<4x520xbf16> to vector<4x512xbf16>
    %68 = vector.extract_strided_slice %31 {offsets = [0, 4], sizes = [4, 512], strides = [1, 1]} : vector<4x520xbf16> to vector<4x512xbf16>
    %69 = vector.extract_strided_slice %60 {offsets = [0, 4], sizes = [4, 512], strides = [1, 1]} : vector<4x520xbf16> to vector<4x512xbf16>
    %70 = vector.extract_strided_slice %31 {offsets = [0, 5], sizes = [4, 512], strides = [1, 1]} : vector<4x520xbf16> to vector<4x512xbf16>
    %71 = vector.extract_strided_slice %60 {offsets = [0, 5], sizes = [4, 512], strides = [1, 1]} : vector<4x520xbf16> to vector<4x512xbf16>
    %72 = vector.extract_strided_slice %31 {offsets = [0, 6], sizes = [4, 512], strides = [1, 1]} : vector<4x520xbf16> to vector<4x512xbf16>
    %73 = vector.extract_strided_slice %60 {offsets = [0, 6], sizes = [4, 512], strides = [1, 1]} : vector<4x520xbf16> to vector<4x512xbf16>
    %74 = vector.extract_strided_slice %31 {offsets = [0, 7], sizes = [4, 512], strides = [1, 1]} : vector<4x520xbf16> to vector<4x512xbf16>
    %75 = vector.extract_strided_slice %60 {offsets = [0, 7], sizes = [4, 512], strides = [1, 1]} : vector<4x520xbf16> to vector<4x512xbf16>
    %76 = vector.extract_strided_slice %31 {offsets = [0, 8], sizes = [4, 512], strides = [1, 1]} : vector<4x520xbf16> to vector<4x512xbf16>
    %cst_17 = arith.constant 0.000000e+00 : bf16
    %77 = vector.broadcast %cst_17 : bf16 to vector<4x512xbf16>
    %78 = tpu.concatenate %61, %62, %63, %64, %65, %66, %67, %68, %69, %70, %71, %72, %73, %74, %75, %77 in 0 : vector<4x512xbf16>, vector<4x512xbf16>, vector<4x512xbf16>, vector<4x512xbf16>, vector<4x512xbf16>, vector<4x512xbf16>, vector<4x512xbf16>, vector<4x512xbf16>, vector<4x512xbf16>, vector<4x512xbf16>, vector<4x512xbf16>, vector<4x512xbf16>, vector<4x512xbf16>, vector<4x512xbf16>, vector<4x512xbf16>, vector<4x512xbf16> -> vector<64x512xbf16>
    %79 = tpu.concatenate %62, %63, %64, %65, %66, %67, %68, %69, %70, %71, %72, %73, %74, %75, %76, %77 in 0 : vector<4x512xbf16>, vector<4x512xbf16>, vector<4x512xbf16>, vector<4x512xbf16>, vector<4x512xbf16>, vector<4x512xbf16>, vector<4x512xbf16>, vector<4x512xbf16>, vector<4x512xbf16>, vector<4x512xbf16>, vector<4x512xbf16>, vector<4x512xbf16>, vector<4x512xbf16>, vector<4x512xbf16>, vector<4x512xbf16>, vector<4x512xbf16> -> vector<64x512xbf16>
    %80 = tpu.concatenate %78, %79 in 1 : vector<64x512xbf16>, vector<64x512xbf16> -> vector<64x1024xbf16>
    %c0_18 = arith.constant 0 : index
    %c0_19 = arith.constant 0 : index
    %81 = vector.load %arg3[%c0_18, %c0_19] : memref<32x64xbf16, #tpu.memory_space<vmem>>, vector<32x64xbf16>
    %cst_20 = arith.constant dense<0.000000e+00> : vector<32x1024xf32>
    %82 = tpu.matmul %81, %80, %cst_20 {dimension_numbers = #tpu.dot_dimension_numbers<[1], [0], [0], [1], [0, 0, 1, 1], [], []>} : vector<32x64xbf16>, vector<64x1024xbf16>, vector<32x1024xf32> -> vector<32x1024xf32>
    %c0_21 = arith.constant 0 : index
    %c0_22 = arith.constant 0 : index
    %83 = vector.load %arg4[%c0_21, %c0_22] : memref<32x1xf32, #tpu.memory_space<vmem>>, vector<32x1xf32>
    %84 = vector.broadcast %83 : vector<32x1xf32> to vector<32x1024xf32>
    %85 = arith.addf %82, %84 : vector<32x1024xf32>
    %86 = vector.extract_strided_slice %85 {offsets = [0, 0], sizes = [32, 512], strides = [1, 1]} : vector<32x1024xf32> to vector<32x512xf32>
    %87 = arith.truncf %86 : vector<32x512xf32> to vector<32x512xbf16>
    %c0_23 = arith.constant 0 : index
    %c0_24 = arith.constant 0 : index
    %c0_25 = arith.constant 0 : index
    %c0_26 = arith.constant 0 : index
    %88 = vector.load %arg5[%c0_23, %c0_24, %c0_25, %c0_26] : memref<1x2x32x512xbf16, #tpu.memory_space<vmem>>, vector<1x1x32x512xbf16>
    %89 = vector.shape_cast %88 : vector<1x1x32x512xbf16> to vector<32x512xbf16>
    %90 = vector.shape_cast %87 : vector<32x512xbf16> to vector<1x1x32x512xbf16>
    tpu.vector_store %arg5[%c0_23, %c0_24, %c0_25, %c0_26], %90 {strides = array<i32>} : memref<1x2x32x512xbf16, #tpu.memory_space<vmem>>, vector<1x1x32x512xbf16>,
    %91 = vector.extract_strided_slice %85 {offsets = [0, 512], sizes = [32, 512], strides = [1, 1]} : vector<32x1024xf32> to vector<32x512xf32>
    %92 = arith.truncf %91 : vector<32x512xf32> to vector<32x512xbf16>
    %c0_27 = arith.constant 0 : index
    %c1 = arith.constant 1 : index
    %c0_28 = arith.constant 0 : index
    %c0_29 = arith.constant 0 : index
    %93 = vector.load %arg5[%c0_27, %c1, %c0_28, %c0_29] : memref<1x2x32x512xbf16, #tpu.memory_space<vmem>>, vector<1x1x32x512xbf16>
    %94 = vector.shape_cast %93 : vector<1x1x32x512xbf16> to vector<32x512xbf16>
    %95 = vector.shape_cast %92 : vector<32x512xbf16> to vector<1x1x32x512xbf16>
    tpu.vector_store %arg5[%c0_27, %c1, %c0_28, %c0_29], %95 {strides = array<i32>} : memref<1x2x32x512xbf16, #tpu.memory_space<vmem>>, vector<1x1x32x512xbf16>,
    %cst_30 = arith.constant dense<0.000000e+00> : vector<32xf32>
    %96 = vector.multi_reduction <add>, %85, %cst_30 [1] : vector<32x1024xf32> to vector<32xf32>
    %97 = vector.shape_cast %96 : vector<32xf32> to vector<32x1xf32>
    %98 = arith.mulf %85, %85 : vector<32x1024xf32>
    %cst_31 = arith.constant dense<0.000000e+00> : vector<32xf32>
    %99 = vector.multi_reduction <add>, %98, %cst_31 [1] : vector<32x1024xf32> to vector<32xf32>
    %100 = vector.shape_cast %99 : vector<32xf32> to vector<32x1xf32>
    %101 = tpu.concatenate %97, %100 in 1 : vector<32x1xf32>, vector<32x1xf32> -> vector<32x2xf32>
    %c0_32 = arith.constant 0 : index
    %c0_33 = arith.constant 0 : index
    %c0_34 = arith.constant 0 : index
    %c0_35 = arith.constant 0 : index
    %102 = vector.load %arg6[%c0_32, %c0_33, %c0_34, %c0_35] : memref<1x1x32x2xf32, #tpu.memory_space<vmem>>, vector<1x1x32x2xf32>
    %103 = vector.shape_cast %102 : vector<1x1x32x2xf32> to vector<32x2xf32>
    %104 = vector.shape_cast %101 : vector<32x2xf32> to vector<1x1x32x2xf32>
    tpu.vector_store %arg6[%c0_32, %c0_33, %c0_34, %c0_35], %104 {strides = array<i32>} : memref<1x1x32x2xf32, #tpu.memory_space<vmem>>, vector<1x1x32x2xf32>,
    return
  }
  func.func @transform_0(%arg0: i32, %arg1: i32) -> (i32, i32, i32, i32) {
    %c0_i32 = arith.constant 0 : i32
    %c0_i32_0 = arith.constant 0 : i32
    %c0_i32_1 = arith.constant 0 : i32
    return %arg0, %arg1, %c0_i32, %c0_i32_0 : i32, i32, i32, i32
  }
  func.func @transform_1(%arg0: i32, %arg1: i32) -> (i32, i32) {
    %c0_i32 = arith.constant 0 : i32
    %c0_i32_0 = arith.constant 0 : i32
    %c0_i32_1 = arith.constant 0 : i32
    return %c0_i32, %c0_i32_0 : i32, i32
  }
  func.func @transform_2(%arg0: i32, %arg1: i32) -> (i32, i32) {
    %c0_i32 = arith.constant 0 : i32
    %c0_i32_0 = arith.constant 0 : i32
    %c0_i32_1 = arith.constant 0 : i32
    return %c0_i32, %c0_i32_0 : i32, i32
  }
  func.func @transform_3(%arg0: i32, %arg1: i32) -> (i32, i32, i32, i32) {
    %c0_i32 = arith.constant 0 : i32
    %c0_i32_0 = arith.constant 0 : i32
    %c0_i32_1 = arith.constant 0 : i32
    return %arg0, %c0_i32, %c0_i32_0, %arg1 : i32, i32, i32, i32
  }
  func.func @transform_4(%arg0: i32, %arg1: i32) -> (i32, i32, i32, i32) {
    %c0_i32 = arith.constant 0 : i32
    %c0_i32_0 = arith.constant 0 : i32
    %c0_i32_1 = arith.constant 0 : i32
    return %arg0, %arg1, %c0_i32, %c0_i32_0 : i32, i32, i32, i32
  }
}

</mosaic_0001>

<bundles_post_ra>
// kernel: tpu_custom_call.1
= control target key start
LH: loop header
LB: loop body
LE: loop exit
PB: predicated region body
PF: predicated region fallthrough
CT: control target
= control target key end

     0   :  { %10 = vsyncpa [#allocation3], 0  ;;  %s3664_s0 = inlined_call_operand.hbm [shape: s32[2,2,2,520], index: 0, kind: input, shape index: {}]   ;;  %s3665_s1 = inlined_call_operand.vmem [shape: bf16[32,64], index: 1, kind: input, shape index: {}]   ;;  %s3666_s2 = inlined_call_operand.vmem [shape: f32[32,1], index: 2, kind: input, shape index: {}]   ;;  %s3667_s3 = inlined_call_operand.hbm [shape: bf16[2,2,32,1024], index: 3, kind: output, shape index: {0}]   ;;  %s3668_s4 = inlined_call_operand.vmem [shape: f32[2,2,32,2], index: 4, kind: output, shape index: {1}]  }
   0x1   :  { %12 = vsyncpa [#allocation3 + $0x1], 0 }
   0x2   :  { %13 = vsyncpa [#allocation4], 0 }
   0x3   :  { %15 = vsyncpa [#allocation4 + $0x1], 0  ;;  %s2263_s15 = smov 0   ;;  %s2265_s16 = smov 0  }
   0x4   :  { %s2267_s17 = smov 0   ;;  %s2269_s18 = smov 0  }
   0x5   :  { %s2271_s19 = smov 0   ;;  %s2273_s20 = smov 0  }
   0x6   :  { %s2275_s21 = smov 0   ;;  %s2277_s22 = smov 0  }
   0x7 LB: > { %s1924_s23 = sadd.s32 4294967295, %s2222_s22   ;;  %s1925_s24 = sadd.s32 4294967294, %s2222_s22   ;;  %s2222_s22 = sphi %s2277_s22, %s21_s22   ;;  %s2218_s21 = sphi %s2275_s21, %s3814_s21   ;;  %s2214_s20 = sphi %s2273_s20, %s3813_s20   ;;  %s2210_s19 = sphi %s2271_s19, %s3812_s19   ;;  %s2206_s18 = sphi %s2269_s18, %s3811_s18   ;;  %s2202_s17 = sphi %s2267_s17, %s3810_s17   ;;  %s2198_s16 = sphi %s2265_s16, %s3809_s16   ;;  %s2194_s15 = sphi %s2263_s15, %s3808_s15  }
   0x8   : > { %s30_s25 = sadd.s32 1, %s2214_s20  ;;  %s33_s26 = sadd.s32 1, %s2218_s21 }
   0x9   : > { %p31_p0 = scmp.ge.s32.totalorder %s30_s25, 2  ;;  %s42_s27 = sadd.s32 1, %s2202_s17 }
   0xa   : > { %p49_p1 = scmp.ne.s32.totalorder %s2202_s17, %s2198_s16  ;;  %p50_p2 = scmp.eq.s32.totalorder %s2222_s22, 0 }
   0xb   : > { %s3816_s25 = smov (%p31_p0, %s30_s25), 0  ;;  %s3818_s26 = smov (!%p31_p0, %s33_s26), %s2218_s21 }
   0xc   : > { %3702 = sst [smem:[#allocation8_spill]] %s3816_s25  ;;  %s38_s28 = ssub.s32 %s2214_s20, %s3816_s25 }
   0xd   : > { %p2316_p3 = por %p50_p2, %p49_p1  ;;  %p35_p4 = scmp.ge.s32.totalorder %s3818_s26, 2 }
   0xe   : > { %p55_p5 = scmp.ne.s32.totalorder %s2198_s16, %s2194_s15  ;;  %p56_p6 = scmp.eq.s32.totalorder %s1924_s23, 0 }
   0xf   : > { %p123_p7 = scmp.eq.s32.totalorder %s1924_s23, 3  ;;  %s3820_s26 = smov (%p35_p4, %s3818_s26), 0 }
  0x10   : > { %3704 = sst [smem:[#allocation9_spill]] %s3820_s26  ;;  %p2324_p8 = por %p56_p6, %p55_p5 }
  0x11   : > { %p2328_p9 = por %p123_p7, %p49_p1  ;;  %s37_s6 = ssub.s32 %s2218_s21, %s3820_s26 }
  0x12   : > { %p129_p10 = scmp.eq.s32.totalorder %s1925_s24, 3  ;;  %s39_s7 = sor.u32 %s38_s28, %s37_s6 }
  0x13   : > { %s3706_s5 = scalar_select %p2328_p9, 1, 0 }
  0x14   : > { %p40_p11 = scmp.eq.s32.totalorder %s39_s7, 0  ;;  %p2334_p12 = por %p129_p10, %p55_p5 }
  0x15   : > { %p2012_p13 = scmp.lt.s32.totalorder %s2222_s22, 4  ;;  %s183_s9 = sand.u32 1, %s2202_s17  }
  0x16   : > { %s3707_s8 = scalar_select %p2334_p12, 1, 0 }
  0x17   : > { %s2341_s10 = scalar_select %p40_p11, %s2202_s17, %s42_s27  }
  0x18   : > { %s1996_s11 = smul.u32 10, %s183_s9  ;;  %p2346_p0 = pnand %p2012_p13, %p2316_p3 }
  0x19   : > { %s1997_s12 = smul.u32 5, %s2214_s20  ;;  %s184_s29 = scalar_lea.sflag [#allocation3], %s183_s9 }
  0x1a   : > { %s1998_s14 = smul.u32 10, %s2218_s21  ;;  %s187_s23 = scalar_lea.vmem [#allocation2], %s1996_s11 }
  0x1b   : > { %s197_s24 = sshll.u32 %s187_s23, 4  ;;  %p2096_p4 = pneg %p2346_p0  ;;  %s2351_s24 = int_to_ptr.vmem [resolvable:$true] %s197_s24 }
  0x1c   : > { %s193_s28 = sadd.s32 %s1998_s14, %s1997_s12  ;;  %s2099_s14 = scalar_lea.hbm %s3664_s0, 640 }
  0x1d   : > { %s1928_s6 = sshll.u32 %s193_s28, 5 }
  0x1e   : > { %s2357_s26 = scalar_lea.hbm %s3664_s0, %s1928_s6 }
  0x1f   : > { %s2094_s25 = scalar_lea.hbm %s2357_s26, 160  ;;  %p2100_p7 = scmp.lt.u32.totalorder %s2357_s26, %s3664_s0 }
  0x20   : > { %p2095_p3 = scmp.ne.s32.totalorder %s2357_s26, %s2094_s25  ;;  %p2101_p10 = scmp.lt.u32.totalorder %s2099_s14, %s2094_s25 }
  0x21   : > { %p2103_p13 = scmp.lt.u32.totalorder %s2094_s25, %s2357_s26 }
  0x22   : > { %p2097_p5 = pnand %p2096_p4, %p2095_p3  ;;  %p2102_p11 = por %p2101_p10, %p2100_p7 }
  0x24   : > { %p2098_p6 = pneg %p2097_p5  ;;  %p2104_p1 = por %p2103_p13, %p2102_p11 }
  0x26   : > { %p2105_p2 = pnand %p2104_p1, %p2098_p6 }
  0x28   : > { %2108 = shalt.err (!%p2105_p2)
}
  0x29   : > { %s2109_s9 = scalar_lea.vmem %s2351_s24, 160  ;;  %s2224_s6 = smov [#allocation2]  }
  0x2a   : > { %p2110_p3 = scmp.ne.s32.totalorder %s2351_s24, %s2109_s9  ;;  %s2114_s7 = sshll.u32 %s2224_s6, 4  ;;  %s2115_s7 = int_to_ptr.vmem [resolvable:$false] %s2114_s7 }
  0x2b   : > { %s2116_s27 = scalar_lea.vmem %s2115_s7, 320  ;;  %p2117_p9 = scmp.lt.s32.totalorder %s2351_s24, %s2115_s7 }
  0x2c   : > { %p2112_p5 = pnand %p2110_p3, %p2096_p4  ;;  %p2118_p7 = scmp.lt.s32.totalorder %s2116_s27, %s2109_s9 }
  0x2e   : > { %p2113_p12 = pneg %p2112_p5  ;;  %p2119_p10 = por %p2118_p7, %p2117_p9 }
  0x30   : > { %p2120_p11 = pnand %p2119_p10, %p2113_p12 }
  0x32   : > { %2123 = shalt.err (!%p2120_p11)
}
  0x33   : > { %2007 = dma.hbm_to_vmem [thread:$0]  (!%p2346_p0), %s2357_s26, 160, %s2351_s24, %s184_s29  }
  0x34   : > { %p3709_p1 = scmp.lt.s32.totalorder %s2222_s22, 5  ;;  %p3710_p2 = scmp.ge.s32.totalorder %s2222_s22, 1 }
  0x36   : > { %p203_p4 = pnand %p3710_p2, %p3709_p1 }
  0x38   : > { %206 = sbr.rel (%p203_p4) target bundleno = 903 (0x387), region = 32 }
  0x3f   : > { %s2390_s25 = sand.u32 1, %s2198_s16  }
  0x40   : > { %s1999_s11 = smul.u32 10, %s2390_s25  ;;  %s209_s12 = scalar_lea.sflag [#allocation3], %s2390_s25 }
  0x42   : > { %s212_s14 = scalar_lea.vmem [#allocation2], %s1999_s11 }
  0x43   : > { %2185 = dma.done.wait (%p2324_p8), %s209_s12, 160  }
  0x44   : > { %2187 = vsyncadd (%p2324_p8), %s209_s12, 4294967136  ;;  %v259_v0 = vlaneseq  ;;  %v3672_v1 = vmov 0   ;;  %v257_v3 = vld [vmem:[%s212_s14] sm:$0xff]  ;;  %v258_v9 = vld [vmem:[%s212_s14 + $0x8] sm:$0x3]  ;;  %v2226_v60 = vmov 0.0  }
  0x45   : > { %1358 = vmatprep.mubr.bf16.mxu0 %v3672_v1  ;;  %1411 = vmatprep.mubr.bf16.mxu1 %v3672_v1  ;;  %v1934_v4 = vadd.s32 4294967289, %v257_v3  ;;  %vm332_vm0 = vcmp.ne.s32.totalorder %v257_v3, 11  ;;  %v2416_v16 = vadd.s32 4294967289, %v258_v9  ;;  %vm333_vm2 = vcmp.ne.s32.totalorder %v258_v9, 11  ;;  %s2227_s26 = smov 126   ;;  %s2228_s30 = smov 127  }
  0x46   : > { %2090 = vset.pattern.permute.xlu1 %v3672_v1  ;;  %2091 = vset.pattern.permute.xlu0 %v3672_v1  ;;  %v2402_v2 = vshrl.u32 %v259_v0, 7  ;;  %v2406_v7 = vsel %vm332_vm0, 1, %v3672_v1  ;;  %v2440_v35 = vsel %vm333_vm2, 1, %v3672_v1  ;;  %s2229_s13 = smov 125   ;;  %s2230_s24 = smov 124  }
  0x47   : > { %v264_v6 = vsub.s32 0, %v1934_v4  ;;  %vm263_vm1 = vcmp.lt.s32.totalorder %v1934_v4, 0  ;;  %v271_v27 = vsub.s32 0, %v2416_v16  ;;  %vm270_vm15 = vcmp.lt.s32.totalorder %v2416_v16, 0  ;;  %s2231_s29 = smov 123   ;;  %s2232_s23 = smov 122  }
  0x48   : > { %v297_v5 = vsub.s32 4, %v2402_v2  ;;  %v293_v8 = vsub.s32 2, %v2402_v2  ;;  %v2410_v11 = vsub.s32 0, %v2402_v2  ;;  %v301_v12 = vsub.s32 6, %v2402_v2  ;;  %s2233_s28 = smov 121   ;;  %s1975_s9 = sshll.u32 %s2206_s18, 2 }
  0x49   : > { %v1936_v10 = vmin.u32 %v1934_v4, %v264_v6  ;;  %v402_v14 = vsub.s32 3, %v2402_v2  ;;  %v406_v15 = vsub.s32 5, %v2402_v2  ;;  %v2420_v19 = vsub.s32 1, %v2402_v2  ;;  %s1976_s6 = sshll.u32 %s2210_s19, 6  ;;  %p3804_p9 = scmp.ne.s32.totalorder %s3706_s5, 0 }
  0x4a   : > { %v347_v13 = vrot.slane %v2406_v7, %v297_v5  ;;  %v343_v18 = vrot.slane %v2406_v7, %v293_v8  ;;  %v410_v20 = vsub.s32 7, %v2402_v2  ;;  %v351_v22 = vrot.slane %v2406_v7, %v301_v12  ;;  %s1787_s7 = sadd.s32 %s1976_s6, %s1975_s9 }
  0x4b   : > { %v267_v17 = vand.u32 3, %v1936_v10  ;;  %v339_v23 = vrot.slane %v2406_v7, %v2410_v11  ;;  %v2428_v25 = vrot.slane %v2406_v7, %v402_v14  ;;  %v452_v26 = vrot.slane %v2406_v7, %v406_v15  ;;  %s1977_s27 = sshll.u32 %s1787_s7, 6 }
  0x4c   : > { %v367_v24 = vrot.slane %v347_v13, %v2410_v11  ;;  %v363_v29 = vrot.slane %v343_v18, %v2410_v11  ;;  %v1937_v31 = vmin.u32 %v2416_v16, %v271_v27  ;;  %v371_v32 = vrot.slane %v351_v22, %v2410_v11  ;;  %s3600_s14 = scalar_lea.hbm %s3667_s3, %s1977_s27 }
  0x4d   : > { %v268_v21 = vsub.s32 0, %v267_v17  ;;  %v359_v33 = vrot.slane %v339_v23, %v2410_v11  ;;  %v2437_v34 = vrot.slane %v2406_v7, %v410_v20  ;;  %v468_v38 = vrot.slane %v2428_v25, %v2420_v19 }
  0x4e   : > { %vm2442_vm6 = vcmp.eq.s32.totalorder %v367_v24, 1  ;;  %v472_v39 = vrot.slane %v452_v26, %v2420_v19  ;;  %vm2450_vm7 = vcmp.eq.s32.totalorder %v363_v29, 1  ;;  %v274_v47 = vand.u32 3, %v1937_v31 }
  0x4f   : > { %v269_v28 = vsel %vm263_vm1, %v268_v21, %v267_v17  ;;  %vm2458_vm8 = vcmp.eq.s32.totalorder %v371_v32, 1  ;;  %vm376_vm9 = vcmp.eq.s32.totalorder %v359_v33, 1  ;;  %v444_v54 = vrot.slane %v2406_v7, %v2420_v19 }
  0x50   : > { %vm277_vm3 = vcmp.ne.s32.totalorder %v269_v28, 0  ;;  %vm279_vm4 = vcmp.lt.s32.totalorder %v269_v28, 0  ;;  %v283_v30 = vadd.s32 4, %v269_v28  ;;  %vm2487_vm1 = vcmp.eq.s32.totalorder %v472_v39, 1 }
  0x51   : > { %vm281_vm5 = vmand %vm279_vm4, %vm277_vm3  ;;  %v476_v63 = vrot.slane %v2437_v34, %v2420_v19  ;;  %v275_v0 = vsub.s32 0, %v274_v47  ;;  %v464_v6 = vrot.slane %v444_v54, %v2420_v19  ;;  %v355_v23 = vrot.slane %v2440_v35, %v2410_v11 }
  0x52   : > { %v285_v36 = vsel %vm281_vm5, %v283_v30, %v269_v28 }
  0x53   : > { %v298_v40 = vrot.slane %v285_v36, %v297_v5  ;;  %v294_v41 = vrot.slane %v285_v36, %v293_v8  ;;  %v302_v42 = vrot.slane %v285_v36, %v301_v12  ;;  %v290_v43 = vrot.slane %v285_v36, %v2410_v11 }
  0x54   : > { %v403_v45 = vrot.slane %v285_v36, %v402_v14  ;;  %v407_v46 = vrot.slane %v285_v36, %v406_v15  ;;  %v399_v53 = vrot.slane %v285_v36, %v2420_v19  ;;  %v411_v59 = vrot.slane %v285_v36, %v410_v20 }
  0x55   : > { %v318_v48 = vrot.slane %v298_v40, %v2410_v11  ;;  %v314_v49 = vrot.slane %v294_v41, %v2410_v11  ;;  %v322_v50 = vrot.slane %v302_v42, %v2410_v11  ;;  %v310_v51 = vrot.slane %v290_v43, %v2410_v11 }
  0x56   : > { %v427_v57 = vrot.slane %v407_v46, %v2420_v19  ;;  %v423_v58 = vrot.slane %v403_v45, %v2420_v19  ;;  %v419_v5 = vrot.slane %v399_v53, %v2420_v19  ;;  %v276_v10 = vsel %vm270_vm15, %v275_v0, %v274_v47 }
  0x57   : > { %vm329_vm10 = vcmp.eq.s32.totalorder %v2402_v2, %v318_v48  ;;  %vm2467_vm11 = vcmp.eq.s32.totalorder %v2402_v2, %v314_v49  ;;  %vm2472_vm12 = vcmp.eq.s32.totalorder %v2402_v2, %v322_v50  ;;  %vm327_vm14 = vcmp.eq.s32.totalorder %v2402_v2, %v310_v51 }
  0x58   : > { %vm383_vm13 = vmand %vm329_vm10, %vm2442_vm6  ;;  %vm2509_vm4 = vcmp.eq.s32.totalorder %v2402_v2, %v427_v57  ;;  %vm2519_vm5 = vcmp.eq.s32.totalorder %v2402_v2, %v423_v58  ;;  %vm2523_vm6 = vcmp.eq.s32.totalorder %v468_v38, 1  ;;  %v431_v15 = vrot.slane %v411_v59, %v2420_v19 }
  0x59   : > { %v388_v61 = vsel %vm383_vm13, 1.0, %v2226_v60  ;;  %vm382_vm0 = vmand %vm2467_vm11, %vm2450_vm7  ;;  %vm278_vm7 = vcmp.ne.s32.totalorder %v276_v10, 0  ;;  %v284_v18 = vadd.s32 4, %v276_v10  ;;  %vm436_vm11 = vcmp.eq.s32.totalorder %v2402_v2, %v419_v5 }
  0x5a   : > { %v2493_v3 = vpack.c.bf16 %v388_v61, %v388_v61  ;;  %v387_v4 = vsel %vm382_vm0, 1.0, %v2226_v60  ;;  %vm384_vm2 = vmand %vm2472_vm12, %vm2458_vm8  ;;  %vm280_vm8 = vcmp.lt.s32.totalorder %v276_v10, 0  ;;  %vm481_vm12 = vcmp.eq.s32.totalorder %v464_v6, 1 }
  0x5b   : > { %v2502_v7 = vpack.c.bf16 %v387_v4, %v387_v4  ;;  %v389_v8 = vsel %vm384_vm2, 1.0, %v2226_v60  ;;  %vm381_vm3 = vmand %vm327_vm14, %vm376_vm9  ;;  %vm2549_vm13 = vcmp.eq.s32.totalorder %v2402_v2, %v431_v15  ;;  %vm2553_vm14 = vcmp.eq.s32.totalorder %v476_v63, 1 }
  0x5c   : > { %904 = vrot.lane.b32.xlu1 %v2493_v3, %s2227_s26  ;;  %v386_v12 = vsel %vm381_vm3, 1.0, %v2226_v60  ;;  %v2530_v16 = vpack.c.bf16 %v389_v8, %v389_v8  ;;  %vm488_vm9 = vmand %vm2509_vm4, %vm2487_vm1  ;;  %v375_v32 = vrot.slane %v355_v23, %v2410_v11  ;;  %v2583_v33 = vrot.slane %v2493_v3, 4 }
  0x5d   : > { %902 = vrot.lane.b32.xlu0 %v2502_v7, %s2227_s26  ;;  %v2532_v17 = vpack.c.bf16 %v386_v12, %v386_v12  ;;  %vm487_vm10 = vmand %vm2519_vm5, %vm2523_vm6  ;;  %v2562_v24 = vrot.slane %v2502_v7, 4  ;;  %v493_v25 = vsel %vm488_vm9, 1.0, %v2226_v60  ;;  %v460_v43 = vrot.slane %v2440_v35, %v2420_v19 }
  0x5e   : > { %v2546_v20 = vrot.slane %v2530_v16, 4  ;;  %vm282_vm15 = vmand %vm280_vm8, %vm278_vm7  ;;  %v492_v27 = vsel %vm487_vm10, 1.0, %v2226_v60  ;;  %v2576_v30 = vpack.c.bf16 %v493_v25, %v493_v25  ;;  %vm380_vm3 = vcmp.eq.s32.totalorder %v375_v32, 1 }
  0x5f   : > { %v286_v26 = vsel %vm282_vm15, %v284_v18, %v276_v10  ;;  %vm486_vm0 = vmand %vm436_vm11, %vm481_vm12  ;;  %v2574_v29 = vrot.slane %v2532_v17, 4  ;;  %v2585_v34 = vpack.c.bf16 %v492_v27, %v492_v27  ;;  %v480_v48 = vrot.slane %v460_v43, %v2420_v19 }
  0x60   : > { %900 = vrot.lane.b32.xlu1 %v2532_v17, %s2227_s26  ;;  %v306_v28 = vrot.slane %v286_v26, %v2410_v11  ;;  %vm489_vm1 = vmand %vm2549_vm13, %vm2553_vm14  ;;  %v491_v36 = vsel %vm486_vm0, 1.0, %v2226_v60  ;;  %v2592_v38 = vrot.slane %v2576_v30, 2  ;;  %v415_v42 = vrot.slane %v286_v26, %v2420_v19 }
  0x61   : > { %906 = vrot.lane.b32.xlu0 %v2530_v16, %s2227_s26  ;;  %v494_v37 = vsel %vm489_vm1, 1.0, %v2226_v60  ;;  %v2594_v39 = vpack.c.bf16 %v491_v36, %v491_v36  ;;  %v2613_v46 = vrot.slane %v2585_v34, 6  ;;  %v2619_v49 = vrot.slane %v2576_v30, 6 }
  0x62   : > { %v326_v31 = vrot.slane %v306_v28, %v2410_v11  ;;  %v882_v11 = vrot.slane %v2585_v34, 2  ;;  %v2600_v40 = vpack.c.bf16 %v494_v37, %v494_v37  ;;  %v435_v47 = vrot.slane %v415_v42, %v2420_v19 }
  0x63   : > { %v881_v41 = vrot.slane %v2594_v39, 2  ;;  %vm485_vm6 = vcmp.eq.s32.totalorder %v480_v48, 1  ;;  %v2639_v51 = vrot.slane %v2594_v39, 6  ;;  %v2746_v61 = vrot.slane %v2502_v7, 6 }
  0x64   : > { %873 = vrot.lane.b32.xlu1 %v2546_v20, %s2228_s30  ;;  %vm331_vm2 = vcmp.eq.s32.totalorder %v2402_v2, %v326_v31  ;;  %v884_v44 = vrot.slane %v2600_v40, 2  ;;  %v2626_v50 = vrot.slane %v2600_v40, 6  ;;  %vm440_vm5 = vcmp.eq.s32.totalorder %v2402_v2, %v435_v47 }
  0x65   : > { %869 = vrot.lane.b32.xlu0 %v2562_v24, %s2228_s30  ;;  %vm385_vm4 = vmand %vm331_vm2, %vm380_vm3  ;;  %v2757_v0 = vrot.slane %v2532_v17, 6  ;;  %v2762_v4 = vrot.slane %v2493_v3, 6  ;;  %v2771_v8 = vrot.slane %v2576_v30, 4  ;;  %v2776_v9 = vrot.slane %v2585_v34, 4 }
  0x66   : > { %v390_v45 = vsel %vm385_vm4, 1.0, %v2226_v60  ;;  %vm490_vm7 = vmand %vm440_vm5, %vm485_vm6  ;;  %v2785_v13 = vrot.slane %v2502_v7, 2  ;;  %v2790_v14 = vrot.slane %v2594_v39, 4  ;;  %v2804_v21 = vrot.slane %v2493_v3, 2 }
  0x67   : > { %v2621_v35 = vpack.c.bf16 %v390_v45, %v390_v45  ;;  %v495_v52 = vsel %vm490_vm7, 1.0, %v2226_v60  ;;  %v2818_v25 = vrot.slane %v2530_v16, 6  ;;  %v2848_v36 = vrot.slane %v2600_v40, 4 }
  0x68   : > { %867 = vrot.lane.b32.xlu1 %v2574_v29, %s2228_s30  ;;  %v2646_v2 = vpack.c.bf16 %v495_v52, %v495_v52  ;;  %v2878_v45 = vrot.slane %v2530_v16, 2  ;;  %vm521_vm8 = vcmask 1039360   ;;  %vm729_vm9 = vcmask 1041408  }
  0x69   : > { %871 = vrot.lane.b32.xlu0 %v2583_v33, %s2228_s30  ;;  %v2632_v19 = vrot.slane %v2621_v35, 4  ;;  %vm565_vm10 = vcmask 1031168   ;;  %vm742_vm11 = vcmask 1043456   ;;  %vm751_vm12 = vcmask 1045504  }
  0x6a   : > { %v885_v53 = vrot.slane %v2646_v2, 2  ;;  %v2661_v54 = vrot.slane %v2646_v2, 6  ;;  %vm594_vm13 = vcmask 1022976   ;;  %vm623_vm14 = vcmask 1014784  }
  0x6b   : > { %vm652_vm15 = vcmask 1006592   ;;  %vm681_vm0 = vcmask 998400   ;;  %vm710_vm1 = vcmask 990208   ;;  %vm1319_vm2 = vcmask 523264  }
  0x6c   : > { %890 = vrot.lane.b32.xlu1 %v2592_v38, %s2228_s30 }
  0x6d   : > { %888 = vrot.lane.b32.xlu0 %v882_v11, %s2228_s30 }
  0x70   : > { %886 = vrot.lane.b32.xlu1 %v881_v41, %s2228_s30 }
  0x71   : > { %892 = vrot.lane.b32.xlu0 %v884_v44, %s2228_s30 }
  0x74   : > { %916 = vrot.lane.b32.xlu1 %v2613_v46, %s2227_s26 }
  0x75   : > { %918 = vrot.lane.b32.xlu0 %v2619_v49, %s2227_s26 }
  0x78   : > { %920 = vrot.lane.b32.xlu1 %v2626_v50, %s2227_s26 }
  0x79   : > { %875 = vrot.lane.b32.xlu0 %v2632_v19, %s2228_s30 }
  0x7c   : > { %930 = vrot.lane.b32.xlu1 %v2562_v24, %s2229_s13 }
  0x7d   : > { %914 = vrot.lane.b32.xlu0 %v2639_v51, %s2227_s26 }
  0x80   : > { %934 = vrot.lane.b32.xlu1 %v2546_v20, %s2229_s13 }
  0x81   : > { %932 = vrot.lane.b32.xlu0 %v2583_v33, %s2229_s13 }
  0x84   : > { %928 = vrot.lane.b32.xlu1 %v2574_v29, %s2229_s13 }
  0x85   : > { %894 = vrot.lane.b32.xlu0 %v885_v53, %s2228_s30 }
  0x88   : > { %946 = vrot.lane.b32.xlu1 %v2592_v38, %s2229_s13 }
  0x89   : > { %944 = vrot.lane.b32.xlu0 %v882_v11, %s2229_s13 }
  0x8c   : > { %942 = vrot.lane.b32.xlu1 %v881_v41, %s2229_s13 }
  0x8d   : > { %948 = vrot.lane.b32.xlu0 %v884_v44, %s2229_s13 }
  0x90   : > { %922 = vrot.lane.b32.xlu1 %v2661_v54, %s2227_s26 }
  0x91   : > { %908 = vrot.lane.b32.xlu0 %v2621_v35, %s2227_s26 }
  0x94   : > { %960 = vrot.lane.b32.xlu1 %v2493_v3, %s2230_s24 }
  0x95   : > { %958 = vrot.lane.b32.xlu0 %v2502_v7, %s2230_s24 }
  0x98   : > { %972 = vrot.lane.b32.xlu1 %v2613_v46, %s2230_s24 }
  0x99   : > { %962 = vrot.lane.b32.xlu0 %v2530_v16, %s2230_s24 }
  0x9c   : > { %976 = vrot.lane.b32.xlu1 %v2626_v50, %s2230_s24 }
  0x9d   : > { %974 = vrot.lane.b32.xlu0 %v2619_v49, %s2230_s24 }
  0xa0   : > { %956 = vrot.lane.b32.xlu1 %v2532_v17, %s2230_s24 }
  0xa1   : > { %936 = vrot.lane.b32.xlu0 %v2632_v19, %s2229_s13 }
  0xa4   : > { %986 = vrot.lane.b32.xlu1 %v2562_v24, %s2231_s29 }
  0xa5   : > { %970 = vrot.lane.b32.xlu0 %v2639_v51, %s2230_s24 }
  0xa8   : > { %990 = vrot.lane.b32.xlu1 %v2546_v20, %s2231_s29 }
  0xa9   : > { %988 = vrot.lane.b32.xlu0 %v2583_v33, %s2231_s29 }
  0xac   : > { %984 = vrot.lane.b32.xlu1 %v2574_v29, %s2231_s29 }
  0xad   : > { %950 = vrot.lane.b32.xlu0 %v885_v53, %s2229_s13 }
  0xb0   : > { %1002 = vrot.lane.b32.xlu1 %v2592_v38, %s2231_s29 }
  0xb1   : > { %1000 = vrot.lane.b32.xlu0 %v882_v11, %s2231_s29 }
  0xb4   : > { %998 = vrot.lane.b32.xlu1 %v881_v41, %s2231_s29 }
  0xb5   : > { %1004 = vrot.lane.b32.xlu0 %v884_v44, %s2231_s29  ;;  %v2873_v44 = vrot.slane %v2621_v35, 2 }
  0xb8   : > { %978 = vrot.lane.b32.xlu1 %v2661_v54, %s2230_s24 }
  0xb9   : > { %964 = vrot.lane.b32.xlu0 %v2621_v35, %s2230_s24 }
  0xbc   : > { %1016 = vrot.lane.b32.xlu1 %v2493_v3, %s2232_s23 }
  0xbd   : > { %1014 = vrot.lane.b32.xlu0 %v2502_v7, %s2232_s23 }
  0xc0   : > { %1028 = vrot.lane.b32.xlu1 %v2613_v46, %s2232_s23 }
  0xc1   : > { %1018 = vrot.lane.b32.xlu0 %v2530_v16, %s2232_s23 }
  0xc4   : > { %1032 = vrot.lane.b32.xlu1 %v2626_v50, %s2232_s23 }
  0xc5   : > { %1030 = vrot.lane.b32.xlu0 %v2619_v49, %s2232_s23 }
  0xc8   : > { %1012 = vrot.lane.b32.xlu1 %v2532_v17, %s2232_s23 }
  0xc9   : > { %992 = vrot.lane.b32.xlu0 %v2632_v19, %s2231_s29 }
  0xcc   : > { %1042 = vrot.lane.b32.xlu1 %v2562_v24, %s2233_s28  ;;  %v2813_v24 = vrot.slane %v2621_v35, 6 }
  0xcd   : > { %1026 = vrot.lane.b32.xlu0 %v2639_v51, %s2232_s23 }
  0xce   : > { %v2724_v55 = vpop.permute.xlu1 %904 }
  0xcf   : > { %v2726_v56 = vpop.permute.xlu0 %902 }
  0xd0   : > { %1046 = vrot.lane.b32.xlu1 %v2546_v20, %s2233_s28  ;;  %v2799_v20 = vrot.slane %v2532_v17, 2 }
  0xd1   : > { %1044 = vrot.lane.b32.xlu0 %v2583_v33, %s2233_s28  ;;  %v2843_v33 = vrot.slane %v2646_v2, 4 }
  0xd2   : > { %v2732_v57 = vpop.permute.xlu1 %900 }
  0xd3   : > { %v2734_v58 = vpop.permute.xlu0 %906 }
  0xd4   : > { %1040 = vrot.lane.b32.xlu1 %v2574_v29, %s2233_s28 }
  0xd5   : > { %1006 = vrot.lane.b32.xlu0 %v885_v53, %s2231_s29 }
  0xd6   : > { %v2739_v59 = vpop.permute.xlu1 %873 }
  0xd7   : > { %v2741_v60 = vpop.permute.xlu0 %869 }
  0xd8   : > { %1034 = vrot.lane.b32.xlu1 %v2661_v54, %s2232_s23 }
  0xd9   : > { %1020 = vrot.lane.b32.xlu0 %v2621_v35, %s2232_s23 }
  0xda   : > { %v2750_v62 = vpop.permute.xlu1 %867 }
  0xdb   : > { %v2752_v63 = vpop.permute.xlu0 %871 }
  0xdc   : > { %513 = vrot.lane.b32.xlu1 %v2746_v61, %s2228_s30 }
  0xdd   : > { %1048 = vrot.lane.b32.xlu0 %v2632_v19, %s2233_s28 }
  0xde   : > { %v2764_v5 = vpop.permute.xlu1 %890 }
  0xdf   : > { %v2766_v6 = vpop.permute.xlu0 %888 }
  0xe0   : > { %511 = vrot.lane.b32.xlu1 %v2757_v0, %s2228_s30 }
  0xe1   : > { %515 = vrot.lane.b32.xlu0 %v2762_v4, %s2228_s30 }
  0xe2   : > { %v2778_v10 = vpop.permute.xlu1 %886 }
  0xe3   : > { %v2780_v12 = vpop.permute.xlu0 %892 }
  0xe4   : > { %540 = vrot.lane.b32.xlu1 %v2771_v8, %s2228_s30 }
  0xe5   : > { %538 = vrot.lane.b32.xlu0 %v2776_v9, %s2228_s30 }
  0xe6   : > { %v2792_v15 = vpop.permute.xlu1 %916 }
  0xe7   : > { %v2794_v18 = vpop.permute.xlu0 %918 }
  0xe8   : > { %557 = vrot.lane.b32.xlu1 %v2785_v13, %s2227_s26 }
  0xe9   : > { %536 = vrot.lane.b32.xlu0 %v2790_v14, %s2228_s30 }
  0xea   : > { %v2806_v22 = vpop.permute.xlu1 %920 }
  0xeb   : > { %v2808_v23 = vpop.permute.xlu0 %875 }
  0xec   : > { %555 = vrot.lane.b32.xlu1 %v2799_v20, %s2227_s26 }
  0xed   : > { %559 = vrot.lane.b32.xlu0 %v2804_v21, %s2227_s26 }
  0xee   : > { %v2820_v26 = vpop.permute.xlu1 %930 }
  0xef   : > { %v2822_v27 = vpop.permute.xlu0 %914 }
  0xf0   : > { %519 = vrot.lane.b32.xlu1 %v2813_v24, %s2228_s30 }
  0xf1   : > { %517 = vrot.lane.b32.xlu0 %v2818_v25, %s2228_s30 }
  0xf2   : > { %v2828_v28 = vpop.permute.xlu1 %934 }
  0xf3   : > { %v2830_v29 = vpop.permute.xlu0 %932 }
  0xf4   : > { %574 = vrot.lane.b32.xlu1 %v2576_v30, %s2227_s26 }
  0xf5   : > { %572 = vrot.lane.b32.xlu0 %v2585_v34, %s2227_s26 }
  0xf6   : > { %v2836_v31 = vpop.permute.xlu1 %928 }
  0xf7   : > { %v2838_v32 = vpop.permute.xlu0 %894 }
  0xf8   : > { %588 = vrot.lane.b32.xlu1 %v2762_v4, %s2229_s13 }
  0xf9   : > { %586 = vrot.lane.b32.xlu0 %v2746_v61, %s2229_s13 }
  0xfa   : > { %v2850_v37 = vpop.permute.xlu1 %946 }
  0xfb   : > { %v2852_v38 = vpop.permute.xlu0 %944 }
  0xfc   : > { %544 = vrot.lane.b32.xlu1 %v2843_v33, %s2228_s30 }
  0xfd   : > { %542 = vrot.lane.b32.xlu0 %v2848_v36, %s2228_s30 }
  0xfe   : > { %v2858_v11 = vpop.permute.xlu1 %942 }
  0xff   : > { %v2860_v41 = vpop.permute.xlu0 %948 }
 0x100   : > { %584 = vrot.lane.b32.xlu1 %v2757_v0, %s2229_s13 }
 0x101   : > { %570 = vrot.lane.b32.xlu0 %v2594_v39, %s2227_s26 }
 0x102   : > { %v2866_v42 = vpop.permute.xlu1 %922 }
 0x103   : > { %v2868_v43 = vpop.permute.xlu0 %908 }
 0x104   : > { %603 = vrot.lane.b32.xlu1 %v2771_v8, %s2229_s13 }
 0x105   : > { %601 = vrot.lane.b32.xlu0 %v2776_v9, %s2229_s13 }
 0x106   : > { %v2880_v47 = vpop.permute.xlu1 %960 }
 0x107   : > { %3733 = vst [vmem:[#allocation10_spill] sm:$0xff] %v2880_v47  ;;  %v2882_v48 = vpop.permute.xlu0 %958 }
 0x108   : > { %3734 = vst [vmem:[#allocation11_spill] sm:$0xff] %v2882_v48  ;;  %563 = vrot.lane.b32.xlu1 %v2873_v44, %s2227_s26 }
 0x109   : > { %561 = vrot.lane.b32.xlu0 %v2878_v45, %s2227_s26 }
 0x10a   : > { %v2888_v19 = vpop.permute.xlu1 %972 }
 0x10b   : > { %3735 = vst [vmem:[#allocation12_spill] sm:$0xff] %v2888_v19  ;;  %v2890_v52 = vpop.permute.xlu0 %962 }
 0x10c   : > { %3736 = vst [vmem:[#allocation13_spill] sm:$0xff] %v2890_v52  ;;  %615 = vrot.lane.b32.xlu1 %v2785_v13, %s2230_s24 }
 0x10d   : > { %599 = vrot.lane.b32.xlu0 %v2790_v14, %s2229_s13 }
 0x10e   : > { %v2896_v53 = vpop.permute.xlu1 %976 }
 0x10f   : > { %3737 = vst [vmem:[#allocation14_spill] sm:$0xff] %v2896_v53  ;;  %v2898_v1 = vpop.permute.xlu0 %974 }
 0x110   : > { %613 = vrot.lane.b32.xlu1 %v2799_v20, %s2230_s24 }
 0x111   : > { %617 = vrot.lane.b32.xlu0 %v2804_v21, %s2230_s24 }
 0x112   : > { %v2904_v48 = vpop.permute.xlu1 %956 }
 0x113   : > { %3738 = vst [vmem:[#allocation15_spill] sm:$0xff] %v2904_v48  ;;  %v2906_v47 = vpop.permute.xlu0 %936 }
 0x114   : > { %3739 = vst [vmem:[#allocation16_spill] sm:$0xff] %v2906_v47  ;;  %578 = vrot.lane.b32.xlu1 %v2646_v2, %s2227_s26 }
 0x115   : > { %576 = vrot.lane.b32.xlu0 %v2600_v40, %s2227_s26 }
 0x116   : > { %v2912_v52 = vpop.permute.xlu1 %986 }
 0x117   : > { %3740 = vst [vmem:[#allocation17_spill] sm:$0xff] %v2912_v52  ;;  %v2914_v53 = vpop.permute.xlu0 %970 }
 0x118   : > { %3741 = vst [vmem:[#allocation18_spill] sm:$0xff] %v2914_v53  ;;  %592 = vrot.lane.b32.xlu1 %v2813_v24, %s2229_s13 }
 0x119   : > { %590 = vrot.lane.b32.xlu0 %v2818_v25, %s2229_s13 }
 0x11a   : > { %v2920_v19 = vpop.permute.xlu1 %990 }
 0x11b   : > { %3742 = vst [vmem:[#allocation19_spill] sm:$0xff] %v2920_v19  ;;  %v2922_v48 = vpop.permute.xlu0 %988 }
 0x11c   : > { %3743 = vst [vmem:[#allocation20_spill] sm:$0xff] %v2922_v48  ;;  %632 = vrot.lane.b32.xlu1 %v2576_v30, %s2230_s24 }
 0x11d   : > { %630 = vrot.lane.b32.xlu0 %v2585_v34, %s2230_s24 }
 0x11e   : > { %v2928_v47 = vpop.permute.xlu1 %984 }
 0x11f   : > { %3744 = vst [vmem:[#allocation21_spill] sm:$0xff] %v2928_v47  ;;  %v2930_v52 = vpop.permute.xlu0 %950 }
 0x120   : > { %3745 = vst [vmem:[#allocation22_spill] sm:$0xff] %v2930_v52  ;;  %646 = vrot.lane.b32.xlu1 %v2762_v4, %s2231_s29 }
 0x121   : > { %644 = vrot.lane.b32.xlu0 %v2746_v61, %s2231_s29 }
 0x122   : > { %v2936_v53 = vpop.permute.xlu1 %1002 }
 0x123   : > { %3746 = vst [vmem:[#allocation23_spill] sm:$0xff] %v2936_v53  ;;  %v2938_v19 = vpop.permute.xlu0 %1000 }
 0x124   : > { %3747 = vst [vmem:[#allocation24_spill] sm:$0xff] %v2938_v19  ;;  %607 = vrot.lane.b32.xlu1 %v2843_v33, %s2229_s13 }
 0x125   : > { %605 = vrot.lane.b32.xlu0 %v2848_v36, %s2229_s13 }
 0x126   : > { %v2944_v48 = vpop.permute.xlu1 %998 }
 0x127   : > { %3748 = vst [vmem:[#allocation25_spill] sm:$0xff] %v2944_v48  ;;  %v2946_v47 = vpop.permute.xlu0 %1004 }
 0x128   : > { %3749 = vst [vmem:[#allocation26_spill] sm:$0xff] %v2946_v47  ;;  %642 = vrot.lane.b32.xlu1 %v2757_v0, %s2231_s29 }
 0x129   : > { %628 = vrot.lane.b32.xlu0 %v2594_v39, %s2230_s24 }
 0x12a   : > { %v2952_v52 = vpop.permute.xlu1 %978 }
 0x12b   : > { %3750 = vst [vmem:[#allocation27_spill] sm:$0xff] %v2952_v52  ;;  %v2954_v53 = vpop.permute.xlu0 %964 }
 0x12c   : > { %3751 = vst [vmem:[#allocation28_spill] sm:$0xff] %v2954_v53  ;;  %661 = vrot.lane.b32.xlu1 %v2771_v8, %s2231_s29 }
 0x12d   : > { %659 = vrot.lane.b32.xlu0 %v2776_v9, %s2231_s29 }
 0x12e   : > { %v2960_v19 = vpop.permute.xlu1 %1016 }
 0x12f   : > { %3752 = vst [vmem:[#allocation29_spill] sm:$0xff] %v2960_v19  ;;  %v2962_v48 = vpop.permute.xlu0 %1014 }
 0x130   : > { %3753 = vst [vmem:[#allocation30_spill] sm:$0xff] %v2962_v48  ;;  %621 = vrot.lane.b32.xlu1 %v2873_v44, %s2230_s24 }
 0x131   : > { %619 = vrot.lane.b32.xlu0 %v2878_v45, %s2230_s24 }
 0x132   : > { %v2968_v47 = vpop.permute.xlu1 %1028 }
 0x133   : > { %3754 = vst [vmem:[#allocation31_spill] sm:$0xff] %v2968_v47  ;;  %v2970_v52 = vpop.permute.xlu0 %1018 }
 0x134   : > { %3755 = vst [vmem:[#allocation32_spill] sm:$0xff] %v2970_v52  ;;  %673 = vrot.lane.b32.xlu1 %v2785_v13, %s2232_s23 }
 0x135   : > { %657 = vrot.lane.b32.xlu0 %v2790_v14, %s2231_s29 }
 0x136   : > { %v2976_v53 = vpop.permute.xlu1 %1032 }
 0x137   : > { %3756 = vst [vmem:[#allocation33_spill] sm:$0xff] %v2976_v53  ;;  %v2978_v19 = vpop.permute.xlu0 %1030 }
 0x138   : > { %671 = vrot.lane.b32.xlu1 %v2799_v20, %s2232_s23 }
 0x139   : > { %675 = vrot.lane.b32.xlu0 %v2804_v21, %s2232_s23 }
 0x13a   : > { %v2984_v48 = vpop.permute.xlu1 %1012 }
 0x13b   : > { %3757 = vst [vmem:[#allocation34_spill] sm:$0xff] %v2984_v48  ;;  %v2986_v47 = vpop.permute.xlu0 %992 }
 0x13c   : > { %3758 = vst [vmem:[#allocation35_spill] sm:$0xff] %v2986_v47  ;;  %636 = vrot.lane.b32.xlu1 %v2646_v2, %s2230_s24 }
 0x13d   : > { %634 = vrot.lane.b32.xlu0 %v2600_v40, %s2230_s24  ;;  %s2234_s24 = smov [#allocation5]  }
 0x13e   : > { %v2992_v13 = vpop.permute.xlu1 %1042 }
 0x13f   : > { %3759 = vst [vmem:[#allocation36_spill] sm:$0xff] %v2992_v13  ;;  %v2994_v52 = vpop.permute.xlu0 %1026 }
 0x140   : > { %3760 = vst [vmem:[#allocation37_spill] sm:$0xff] %v2994_v52  ;;  %650 = vrot.lane.b32.xlu1 %v2813_v24, %s2231_s29 }
 0x141   : > { %648 = vrot.lane.b32.xlu0 %v2818_v25, %s2231_s29 }
 0x142   : > { %v3000_v20 = vpop.permute.xlu1 %1046 }
 0x143   : > { %3761 = vst [vmem:[#allocation38_spill] sm:$0xff] %v3000_v20  ;;  %v3002_v21 = vpop.permute.xlu0 %1044 }
 0x144   : > { %3762 = vst [vmem:[#allocation39_spill] sm:$0xff] %v3002_v21  ;;  %665 = vrot.lane.b32.xlu1 %v2843_v33, %s2231_s29 }
 0x145   : > { %663 = vrot.lane.b32.xlu0 %v2848_v36, %s2231_s29  ;;  %s2128_s29 = sshll.u32 %s2234_s24, 4  ;;  %s2129_s29 = int_to_ptr.vmem [resolvable:$false] %s2128_s29 }
 0x146   : > { %v3008_v48 = vpop.permute.xlu1 %1040 }
 0x147   : > { %3763 = vst [vmem:[#allocation40_spill] sm:$0xff] %v3008_v48  ;;  %v3010_v13 = vpop.permute.xlu0 %1006 }
 0x148   : > { %3764 = vst [vmem:[#allocation41_spill] sm:$0xff] %v3010_v13  ;;  %688 = vrot.lane.b32.xlu1 %v2585_v34, %s2232_s23 }
 0x149   : > { %686 = vrot.lane.b32.xlu0 %v2594_v39, %s2232_s23 }
 0x14a   : > { %v3016_v52 = vpop.permute.xlu1 %1034 }
 0x14b   : > { %3765 = vst [vmem:[#allocation42_spill] sm:$0xff] %v3016_v52  ;;  %v3018_v20 = vpop.permute.xlu0 %1020 }
 0x14c   : > { %3766 = vst [vmem:[#allocation43_spill] sm:$0xff] %v3018_v20  ;;  %700 = vrot.lane.b32.xlu1 %v2757_v0, %s2233_s28 }
 0x14d   : > { %690 = vrot.lane.b32.xlu0 %v2576_v30, %s2232_s23 }
 0x14e   : > { %v514_v21 = vpop.permute.xlu1 %513 }
 0x14f   : > { %v3024_v48 = vpop.permute.xlu0 %1048 }
 0x150   : > { %3767 = vst [vmem:[#allocation44_spill] sm:$0xff] %v3024_v48  ;;  %704 = vrot.lane.b32.xlu1 %v2762_v4, %s2233_s28 }
 0x151   : > { %702 = vrot.lane.b32.xlu0 %v2746_v61, %s2233_s28 }
 0x152   : > { %v512_v13 = vpop.permute.xlu1 %511 }
 0x153   : > { %v3030_v47 = vpop.permute.xlu0 %515  ;;  %v522_v4 = vsel %vm521_vm8, %v512_v13, %v514_v21 }
 0x154   : > { %679 = vrot.lane.b32.xlu1 %v2873_v44, %s2232_s23  ;;  %v523_v44 = vsel %vm521_vm8, %v514_v21, %v3030_v47 }
 0x155   : > { %677 = vrot.lane.b32.xlu0 %v2878_v45, %s2232_s23  ;;  %v735_v21 = vsel %vm729_vm9, %v2585_v34, %v523_v44 }
 0x156   : > { %v3036_v0 = vpop.permute.xlu1 %540 }
 0x157   : > { %v539_v20 = vpop.permute.xlu0 %538 }
 0x158   : > { %717 = vrot.lane.b32.xlu1 %v2776_v9, %s2233_s28  ;;  %v547_v9 = vsel %vm521_vm8, %v539_v20, %v3036_v0 }
 0x159   : > { %715 = vrot.lane.b32.xlu0 %v2790_v14, %s2233_s28  ;;  %v732_v14 = vsel %vm729_vm9, %v2594_v39, %v522_v4 }
 0x15a   : > { %v558_v61 = vpop.permute.xlu1 %557 }
 0x15b   : > { %v537_v48 = vpop.permute.xlu0 %536 }
 0x15c   : > { %v546_v52 = vsel %vm521_vm8, %v537_v48, %v539_v20  ;;  %692 = vrot.lane.b32.xlu1 %v2600_v40, %s2232_s23 }
 0x15d   : > { %719 = vrot.lane.b32.xlu0 %v2771_v8, %s2233_s28  ;;  %v744_v53 = vsel %vm742_vm11, %v732_v14, %v546_v52  ;;  %v746_v8 = vsel %vm742_vm11, %v735_v21, %v547_v9  ;;  %v878_v52 = vsel %vm521_vm8, %v2741_v60, %v2752_v63  ;;  %v1056_v9 = vsel %vm729_vm9, %v2532_v17, %v2639_v51 }
 0x15e   : > { %v556_v45 = vpop.permute.xlu1 %555  ;;  %v896_v17 = vsel %vm521_vm8, %v2778_v10, %v2766_v6  ;;  %v1068_v51 = vsel %vm729_vm9, %v2621_v35, %v2661_v54  ;;  %v911_v35 = vsel %vm565_vm10, %v2726_v56, %v2724_v55 }
 0x15f   : > { %v3054_v13 = vpop.permute.xlu0 %559  ;;  %v566_v48 = vsel %vm565_vm10, %v556_v45, %v558_v61 }
 0x160   : > { %v567_v20 = vsel %vm565_vm10, %v558_v61, %v3054_v13  ;;  %706 = vrot.lane.b32.xlu1 %v2818_v25, %s2233_s28  ;;  %v753_v39 = vsel %vm751_vm12, %v744_v53, %v566_v48  ;;  %v1059_v25 = vsel %vm729_vm9, %v2502_v7, %v2613_v46  ;;  %v877_v7 = vsel %vm521_vm8, %v2750_v62, %v2741_v60 }
 0x161   : > { %694 = vrot.lane.b32.xlu0 %v2646_v2, %s2232_s23  ;;  %v756_v4 = vsel %vm751_vm12, %v746_v8, %v567_v20  ;;  %v897_v2 = vsel %vm521_vm8, %v2766_v6, %v2764_v5  ;;  %v1072_v44 = vsel %vm742_vm11, %v1059_v25, %v878_v52  ;;  %v1065_v60 = vsel %vm729_vm9, %v2530_v16, %v2626_v50  ;;  %s1930_s23 = sshll.u32 %s2390_s25, 7 }
 0x162   : > { %1326 = vmatprep.subr.bf16.mxu0 %v756_v4  ;;  %v3069_v34 = vpop.permute.xlu1 %519  ;;  %v1082_v14 = vsel %vm751_vm12, %v1072_v44, %v897_v2  ;;  %v1070_v54 = vsel %vm742_vm11, %v1056_v9, %v877_v7  ;;  %v926_v16 = vsel %vm565_vm10, %v2794_v18, %v2806_v22  ;;  %v910_v62 = vsel %vm565_vm10, %v2732_v57, %v2726_v56  ;;  %v3769_v2 = vld [vmem:[#allocation14_spill] sm:$0xff] }
 0x163   : > { %v3074_v61 = vpop.permute.xlu0 %517  ;;  %1327 = vmatpush1.bf16.msra.mxu0 %v753_v39  ;;  %v1080_v10 = vsel %vm751_vm12, %v1070_v54, %v896_v17  ;;  %v924_v56 = vsel %vm565_vm10, %v2822_v27, %v2792_v15  ;;  %v939_v48 = vsel %vm594_vm13, %v2820_v26, %v2830_v29  ;;  %v953_v27 = vsel %vm594_vm13, %v2852_v38, %v2850_v37  ;;  %v3771_v17 = vld [vmem:[#allocation11_spill] sm:$0xff] }
 0x164   : > { %721 = vrot.lane.b32.xlu1 %v2848_v36, %s2233_s28  ;;  %v879_v36 = vsel %vm521_vm8, %v2752_v63, %v2739_v59  ;;  %v880_v63 = vsel %vm521_vm8, %v2739_v59, %v2808_v23  ;;  %v1078_v59 = vsel %vm742_vm11, %v1068_v51, %v2808_v23  ;;  %v938_v23 = vsel %vm594_vm13, %v2836_v31, %v2820_v26 }
 0x165   : > { %708 = vrot.lane.b32.xlu0 %v2813_v24, %s2233_s28  ;;  %v1062_v24 = vsel %vm729_vm9, %v2493_v3, %v2619_v49  ;;  %v898_v3 = vsel %vm521_vm8, %v2764_v5, %v2780_v12  ;;  %v925_v49 = vsel %vm565_vm10, %v2792_v15, %v2794_v18  ;;  %v912_v18 = vsel %vm565_vm10, %v2724_v55, %v2734_v58 }
 0x166   : > { %v3086_v53 = vpop.permute.xlu1 %574  ;;  %v1074_v6 = vsel %vm742_vm11, %v1062_v24, %v879_v36  ;;  %v1097_v45 = vsel %vm729_vm9, %v912_v18, %v926_v16  ;;  %v899_v55 = vsel %vm521_vm8, %v2780_v12, %v2838_v32  ;;  %v940_v15 = vsel %vm594_vm13, %v2830_v29, %v2828_v28  ;;  %v3770_v36 = vld [vmem:[#allocation10_spill] sm:$0xff]  ;;  %v3775_v16 = vld [vmem:[#allocation20_spill] sm:$0xff]  ;;  %v3778_v18 = vld [vmem:[#allocation15_spill] sm:$0xff] }
 0x167   : > { %v3095_v46 = vpop.permute.xlu0 %572  ;;  %v1084_v57 = vsel %vm751_vm12, %v1074_v6, %v898_v3  ;;  %v1076_v20 = vsel %vm742_vm11, %v1065_v60, %v880_v63  ;;  %v1091_v8 = vsel %vm729_vm9, %v910_v62, %v924_v56  ;;  %v954_v12 = vsel %vm594_vm13, %v2850_v37, %v2860_v41  ;;  %v3772_v60 = vld [vmem:[#allocation16_spill] sm:$0xff]  ;;  %v3776_v62 = vld [vmem:[#allocation17_spill] sm:$0xff]  ;;  %v3777_v6 = vld [vmem:[#allocation22_spill] sm:$0xff] }
 0x168   : > { %1211 = vrot.lane.b32.xlu1 %v1082_v14, %s2228_s30  ;;  %v952_v29 = vsel %vm594_vm13, %v2858_v11, %v2852_v38  ;;  %v1088_v26 = vsel %vm751_vm12, %v1078_v59, %v2838_v32  ;;  %v913_v31 = vsel %vm565_vm10, %v2734_v58, %v2868_v43  ;;  %v927_v4 = vsel %vm565_vm10, %v2806_v22, %v2866_v42  ;;  %v3768_v11 = vld [vmem:[#allocation12_spill] sm:$0xff]  ;;  %v3779_v56 = vld [vmem:[#allocation19_spill] sm:$0xff]  ;;  %v3780_v59 = vld [vmem:[#allocation21_spill] sm:$0xff] }
 0x169   : > { %723 = vrot.lane.b32.xlu0 %v2843_v33, %s2233_s28  ;;  %v1094_v33 = vsel %vm729_vm9, %v911_v35, %v925_v49  ;;  %v1086_v52 = vsel %vm751_vm12, %v1076_v20, %v899_v55  ;;  %v1105_v38 = vsel %vm742_vm11, %v1091_v8, %v938_v23  ;;  %v981_v32 = vsel %vm623_vm14, %v3768_v11, %v2898_v1  ;;  %v3774_v49 = vld [vmem:[#allocation13_spill] sm:$0xff]  ;;  %v3781_v55 = vld [vmem:[#allocation23_spill] sm:$0xff]  ;;  %v3783_v8 = vld [vmem:[#allocation26_spill] sm:$0xff]  ;;  %s3544_s28 = scalar_lea.vmem [#allocation5], %s1930_s23  ;;  %s2130_s23 = scalar_lea.vmem %s2129_s29, 4096 }
 0x16a   : > { %v3129_v50 = vpop.permute.xlu1 %588  ;;  %v1107_v37 = vsel %vm742_vm11, %v1094_v33, %v939_v48  ;;  %v1109_v25 = vsel %vm742_vm11, %v1097_v45, %v940_v15  ;;  %v1103_v22 = vsel %vm729_vm9, %v2868_v43, %v2866_v42  ;;  %v982_v44 = vsel %vm623_vm14, %v2898_v1, %v3769_v2  ;;  %v3773_v43 = vld [vmem:[#allocation18_spill] sm:$0xff]  ;;  %v3782_v15 = vld [vmem:[#allocation24_spill] sm:$0xff]  ;;  %s1790_s26 = sshll.u32 %s3544_s28, 4  ;;  %s3603_s26 = int_to_ptr.vmem [resolvable:$true] %s1790_s26 }
 0x16b   : > { %v3137_v5 = vpop.permute.xlu0 %586  ;;  %v1117_v58 = vsel %vm751_vm12, %v1107_v37, %v953_v27  ;;  %v1119_v7 = vsel %vm751_vm12, %v1109_v25, %v954_v12  ;;  %v1115_v14 = vsel %vm751_vm12, %v1105_v38, %v952_v29  ;;  %v1100_v24 = vsel %vm729_vm9, %v913_v31, %v927_v4  ;;  %v3784_v29 = vld [vmem:[#allocation25_spill] sm:$0xff]  ;;  %s2124_s13 = scalar_lea.vmem %s3603_s26, 2048  ;;  %p2131_p6 = scmp.lt.s32.totalorder %s3603_s26, %s2129_s29 }
 0x16c   : > { %1209 = vrot.lane.b32.xlu1 %v1080_v10, %s2228_s30  ;;  %v967_v51 = vsel %vm623_vm14, %v3771_v17, %v3770_v36  ;;  %v941_v42 = vsel %vm594_vm13, %v2828_v28, %v3772_v60  ;;  %v980_v1 = vsel %vm623_vm14, %v3773_v43, %v3768_v11  ;;  %v968_v35 = vsel %vm623_vm14, %v3770_v36, %v3774_v49  ;;  %p2125_p8 = scmp.ne.s32.totalorder %s3603_s26, %s2124_s13  ;;  %p2132_p13 = scmp.lt.s32.totalorder %s2130_s23, %s2124_s13 }
 0x16d   : > { %1213 = vrot.lane.b32.xlu0 %v1084_v57, %s2228_s30  ;;  %v1129_v54 = vsel %vm729_vm9, %v967_v51, %v981_v32  ;;  %v995_v63 = vsel %vm652_vm15, %v3776_v62, %v3775_v16  ;;  %v955_v28 = vsel %vm594_vm13, %v2860_v41, %v3777_v6  ;;  %v1132_v10 = vsel %vm729_vm9, %v968_v35, %v982_v44  ;;  %v3785_v44 = vld [vmem:[#allocation28_spill] sm:$0xff]  ;;  %v3788_v35 = vld [vmem:[#allocation33_spill] sm:$0xff] }
 0x16e   : > { %v545_v21 = vpop.permute.xlu1 %544  ;;  %v966_v33 = vsel %vm623_vm14, %v3778_v18, %v3771_v17  ;;  %v996_v57 = vsel %vm652_vm15, %v3775_v16, %v3779_v56  ;;  %v994_v45 = vsel %vm652_vm15, %v3780_v59, %v3776_v62  ;;  %v1113_v41 = vsel %vm742_vm11, %v1103_v22, %v3772_v60  ;;  %v3790_v16 = vld [vmem:[#allocation30_spill] sm:$0xff]  ;;  %p2126_p12 = pnand %p2125_p8, %p3804_p9  ;;  %p2133_p3 = por %p2132_p13, %p2131_p6 }
 0x16f   : > { %v543_v39 = vpop.permute.xlu0 %542  ;;  %v1126_v48 = vsel %vm729_vm9, %v966_v33, %v980_v1  ;;  %v1009_v23 = vsel %vm652_vm15, %v3782_v15, %v3781_v55  ;;  %v1111_v20 = vsel %vm742_vm11, %v1100_v24, %v941_v42  ;;  %v1010_v12 = vsel %vm652_vm15, %v3781_v55, %v3783_v8  ;;  %v3793_v18 = vld [vmem:[#allocation38_spill] sm:$0xff] }
 0x170   : > { %1217 = vrot.lane.b32.xlu1 %v1088_v26, %s2228_s30  ;;  %v1008_v26 = vsel %vm652_vm15, %v3784_v29, %v3782_v15  ;;  %v1121_v4 = vsel %vm751_vm12, %v1111_v20, %v955_v28  ;;  %v1140_v37 = vsel %vm742_vm11, %v1126_v48, %v994_v45  ;;  %v524_v38 = vsel %vm521_vm8, %v3030_v47, %v3074_v61  ;;  %v3792_v28 = vld [vmem:[#allocation35_spill] sm:$0xff]  ;;  %v3795_v45 = vld [vmem:[#allocation41_spill] sm:$0xff]  ;;  %p2127_p0 = pneg %p2126_p12 }
 0x171   : > { %1215 = vrot.lane.b32.xlu0 %v1086_v52, %s2228_s30  ;;  %v1142_v52 = vsel %vm742_vm11, %v1129_v54, %v995_v63  ;;  %v525_v11 = vsel %vm521_vm8, %v3074_v61, %v3069_v34  ;;  %v1144_v32 = vsel %vm742_vm11, %v1132_v10, %v996_v57  ;;  %v549_v25 = vsel %vm521_vm8, %v543_v39, %v545_v21  ;;  %v3786_v61 = vld [vmem:[#allocation27_spill] sm:$0xff]  ;;  %v3789_v54 = vld [vmem:[#allocation29_spill] sm:$0xff]  ;;  %v3791_v63 = vld [vmem:[#allocation32_spill] sm:$0xff] }
 0x172   : > { %v3201_v9 = vpop.permute.xlu1 %584  ;;  %v1123_v22 = vsel %vm751_vm12, %v1113_v41, %v3777_v6  ;;  %v1152_v47 = vsel %vm751_vm12, %v1142_v52, %v1009_v23  ;;  %v969_v34 = vsel %vm623_vm14, %v3774_v49, %v3785_v44  ;;  %v1150_v21 = vsel %vm751_vm12, %v1140_v37, %v1008_v26  ;;  %p2134_p5 = pnand %p2133_p3, %p2127_p0 }
 0x173   : > { %v571_v3 = vpop.permute.xlu0 %570  ;;  %v738_v17 = vsel %vm729_vm9, %v2576_v30, %v524_v38  ;;  %v741_v51 = vsel %vm729_vm9, %v2600_v40, %v525_v11  ;;  %v1038_v30 = vsel %vm681_vm0, %v2978_v19, %v3788_v35  ;;  %v1023_v62 = vsel %vm681_vm0, %v3790_v16, %v3789_v54  ;;  %v3797_v11 = vld [vmem:[#allocation42_spill] sm:$0xff] }
 0x174   : > { %1223 = vrot.lane.b32.xlu1 %v1119_v7, %s2228_s30  ;;  %v983_v7 = vsel %vm623_vm14, %v3769_v2, %v3786_v61  ;;  %v750_v43 = vsel %vm742_vm11, %v741_v51, %v549_v25  ;;  %v1024_v6 = vsel %vm681_vm0, %v3789_v54, %v3791_v63  ;;  %v997_v10 = vsel %vm652_vm15, %v3779_v56, %v3792_v28 }
 0x175   : > { %1221 = vrot.lane.b32.xlu0 %v1117_v58, %s2228_s30  ;;  %v548_v58 = vsel %vm521_vm8, %v3036_v0, %v543_v39  ;;  %v1154_v0 = vsel %vm751_vm12, %v1144_v32, %v1010_v12  ;;  %v1138_v39 = vsel %vm729_vm9, %v3785_v44, %v3786_v61  ;;  %v1135_v49 = vsel %vm729_vm9, %v969_v34, %v983_v7  ;;  %v3799_v7 = vld [vmem:[#allocation37_spill] sm:$0xff] }
 0x176   : > { %v3243_v27 = vpop.permute.xlu1 %603  ;;  %v748_v1 = vsel %vm742_vm11, %v738_v17, %v548_v58  ;;  %v1011_v41 = vsel %vm652_vm15, %v3783_v8, %v3795_v45  ;;  %v580_v48 = vsel %vm565_vm10, %v571_v3, %v3095_v46  ;;  %v595_v55 = vsel %vm594_vm13, %v3201_v9, %v3137_v5  ;;  %v3796_v3 = vld [vmem:[#allocation36_spill] sm:$0xff] }
 0x177   : > { %v602_v31 = vpop.permute.xlu0 %601  ;;  %v1167_v15 = vsel %vm729_vm9, %v1024_v6, %v1038_v30  ;;  %v1148_v23 = vsel %vm742_vm11, %v1138_v39, %v3792_v28  ;;  %v596_v20 = vsel %vm594_vm13, %v3137_v5, %v3129_v50  ;;  %v1146_v29 = vsel %vm742_vm11, %v1135_v49, %v997_v10  ;;  %v3801_v17 = vld [vmem:[#allocation40_spill] sm:$0xff] }
 0x178   : > { %1225 = vrot.lane.b32.xlu1 %v1121_v4, %s2228_s30  ;;  %v610_v9 = vsel %vm594_vm13, %v602_v31, %v3243_v27  ;;  %v581_v5 = vsel %vm565_vm10, %v3095_v46, %v3086_v53  ;;  %v766_v4 = vsel %vm729_vm9, %v580_v48, %v595_v55  ;;  %v1156_v37 = vsel %vm751_vm12, %v1146_v29, %v1011_v41  ;;  %v1288_v55 = vld [vmem:[%s3666_s2 + $0x18] sm:$0xff] }
 0x179   : > { %1219 = vrot.lane.b32.xlu0 %v1115_v14, %s2228_s30  ;;  %v3787_v14 = vld [vmem:[#allocation31_spill] sm:$0xff]  ;;  %v1158_v38 = vsel %vm751_vm12, %v1148_v23, %v3795_v45  ;;  %v769_v32 = vsel %vm729_vm9, %v581_v5, %v596_v20  ;;  %v1050_v51 = vsel %vm710_vm1, %v3801_v17, %v3796_v3  ;;  %v1287_v45 = vld [vmem:[%s3666_s2 + $0x10] sm:$0xff] }
 0x17a   : > { %v564_v24 = vpop.permute.xlu1 %563  ;;  %v1037_v36 = vsel %vm681_vm0, %v3787_v14, %v2978_v19  ;;  %v3794_v19 = vld [vmem:[#allocation39_spill] sm:$0xff]  ;;  %v779_v34 = vsel %vm742_vm11, %v769_v32, %v610_v9 }
 0x17b   : > { %v562_v2 = vpop.permute.xlu0 %561  ;;  %v1052_v33 = vsel %vm710_vm1, %v3794_v19, %v3793_v18  ;;  %v1164_v59 = vsel %vm729_vm9, %v1023_v62, %v1037_v36  ;;  %v1051_v12 = vsel %vm710_vm1, %v3796_v3, %v3794_v19  ;;  %v1285_v19 = vld [vmem:[%s3666_s2] sm:$0xff] }
 0x17c   : > { %v568_v60 = vsel %vm565_vm10, %v3054_v13, %v562_v2  ;;  %v569_v42 = vsel %vm565_vm10, %v562_v2, %v564_v24  ;;  %1231 = vrot.lane.b32.xlu1 %v1152_v47, %s2228_s30  ;;  %v1179_v26 = vsel %vm742_vm11, %v1167_v15, %v1052_v33  ;;  %v1036_v24 = vsel %vm681_vm0, %v3799_v7, %v3787_v14 }
 0x17d   : > { %1227 = vrot.lane.b32.xlu0 %v1123_v22, %s2228_s30  ;;  %v762_v40 = vsel %vm751_vm12, %v750_v43, %v569_v42  ;;  %v759_v13 = vsel %vm751_vm12, %v748_v1, %v568_v60  ;;  %v3798_v22 = vld [vmem:[#allocation43_spill] sm:$0xff]  ;;  %v1177_v36 = vsel %vm742_vm11, %v1164_v59, %v1051_v12  ;;  %v3802_v60 = vld [vmem:[#allocation34_spill] sm:$0xff]  ;;  %v1186_v1 = vsel %vm751_vm12, %v1179_v26, 0 }
 0x17e   : > { %1379 = vmatprep.subr.bf16.mxu1 %v762_v40  ;;  %v616_v57 = vpop.permute.xlu1 %615  ;;  %v1025_v47 = vsel %vm681_vm0, %v3791_v63, %v3798_v22  ;;  %v1022_v14 = vsel %vm681_vm0, %v3802_v60, %v3790_v16  ;;  %v1173_v62 = vsel %vm729_vm9, %v3798_v22, %v3797_v11 }
 0x17f   : > { %v600_v56 = vpop.permute.xlu0 %599  ;;  %1380 = vmatpush1.bf16.msra.mxu1 %v759_v13  ;;  %v1161_v49 = vsel %vm729_vm9, %v1022_v14, %v1036_v24 }
 0x180   : > { %v609_v8 = vsel %vm594_vm13, %v600_v56, %v602_v31  ;;  %1229 = vrot.lane.b32.xlu1 %v1150_v21, %s2228_s30  ;;  %v1039_v31 = vsel %vm681_vm0, %v3788_v35, %v3797_v11  ;;  %v1185_v35 = vsel %vm751_vm12, %v1177_v36, 0  ;;  %v1175_v40 = vsel %vm742_vm11, %v1161_v49, %v1050_v51 }
 0x181   : > { %1233 = vrot.lane.b32.xlu0 %v1154_v0, %s2228_s30  ;;  %v777_v46 = vsel %vm742_vm11, %v766_v4, %v609_v8  ;;  %v3800_v0 = vld [vmem:[#allocation44_spill] sm:$0xff]  ;;  %v1170_v42 = vsel %vm729_vm9, %v1025_v47, %v1039_v31  ;;  %v1184_v63 = vsel %vm751_vm12, %v1175_v40, 0 }
 0x182   : > { %v614_v52 = vpop.permute.xlu1 %613  ;;  %v1053_v21 = vsel %vm710_vm1, %v3793_v18, %v3800_v0  ;;  %v1183_v6 = vsel %vm742_vm11, %v1173_v62, %v3800_v0 }
 0x183   : > { %v3349_v58 = vpop.permute.xlu0 %617  ;;  %v624_v25 = vsel %vm623_vm14, %v614_v52, %v616_v57  ;;  %v1181_v30 = vsel %vm742_vm11, %v1170_v42, %v1053_v21  ;;  %v1188_v18 = vsel %vm751_vm12, %v1183_v6, 0 }
 0x184   : > { %v625_v44 = vsel %vm623_vm14, %v616_v57, %v3349_v58  ;;  %1237 = vrot.lane.b32.xlu1 %v1158_v38, %s2228_s30  ;;  %v785_v61 = vsel %vm751_vm12, %v777_v46, %v624_v25  ;;  %v1187_v16 = vsel %vm751_vm12, %v1181_v30, 0  ;;  %v1286_v57 = vld [vmem:[%s3666_s2 + $0x8] sm:$0xff] }
 0x185   : > { %1235 = vrot.lane.b32.xlu0 %v1156_v37, %s2228_s30  ;;  %v788_v39 = vsel %vm751_vm12, %v779_v34, %v625_v44 }
 0x186   : > { %1328 = vmatprep.subr.bf16.mxu0 %v788_v39  ;;  %v579_v2 = vpop.permute.xlu1 %578 }
 0x187   : > { %v577_v43 = vpop.permute.xlu0 %576  ;;  %1329 = vmatpush1.bf16.msra.mxu0 %v785_v61 }
 0x188   : > { %1243 = vrot.lane.b32.xlu1 %v1186_v1, %s2228_s30  ;;  %v582_v29 = vsel %vm565_vm10, %v3086_v53, %v577_v43  ;;  %v583_v26 = vsel %vm565_vm10, %v577_v43, %v579_v2 }
 0x189   : > { %1241 = vrot.lane.b32.xlu0 %v1185_v35, %s2228_s30 }
 0x18a   : > { %v593_v13 = vpop.permute.xlu1 %592 }
 0x18b   : > { %v591_v54 = vpop.permute.xlu0 %590 }
 0x18c   : > { %1245 = vrot.lane.b32.xlu1 %v1187_v16, %s2228_s30  ;;  %v597_v8 = vsel %vm594_vm13, %v3129_v50, %v591_v54  ;;  %v598_v3 = vsel %vm594_vm13, %v591_v54, %v593_v13 }
 0x18d   : > { %1239 = vrot.lane.b32.xlu0 %v1184_v63, %s2228_s30  ;;  %v772_v4 = vsel %vm729_vm9, %v582_v29, %v597_v8  ;;  %v775_v52 = vsel %vm729_vm9, %v583_v26, %v598_v3 }
 0x18e   : > { %v3393_v28 = vpop.permute.xlu1 %632 }
 0x18f   : > { %v631_v10 = vpop.permute.xlu0 %630 }
 0x190   : > { %1291 = vperm.xlu1 %2090, %v1285_v19   ;;  %v639_v34 = vsel %vm623_vm14, %v631_v10, %v3393_v28 }
 0x191   : > { %1247 = vrot.lane.b32.xlu0 %v1188_v18, %s2228_s30  ;;  %s1766_s30 = scalar_lea.sflag [#allocation4], %s2390_s25 }
 0x192   : > { %v3400_v33 = vpop.permute.xlu1 %646 }
 0x193   : > { %v645_v59 = vpop.permute.xlu0 %644 }
 0x194   : > { %1301 = vperm.xlu1 %2090, %v1287_v45  }
 0x195   : > { %1296 = vperm.xlu0 %2091, %v1286_v57  }
 0x196   : > { %v608_v41 = vpop.permute.xlu1 %607 }
 0x197   : > { %v606_v48 = vpop.permute.xlu0 %605 }
 0x198   : > { %1306 = vperm.xlu1 %2090, %v1288_v55   ;;  %v611_v12 = vsel %vm594_vm13, %v3243_v27, %v606_v48  ;;  %v612_v9 = vsel %vm594_vm13, %v606_v48, %v608_v41 }
 0x199   : > { %v783_v27 = vsel %vm742_vm11, %v775_v52, %v612_v9  ;;  %v781_v11 = vsel %vm742_vm11, %v772_v4, %v611_v12 }
 0x19a   : > { %v643_v56 = vpop.permute.xlu1 %642 }
 0x19b   : > { %v629_v15 = vpop.permute.xlu0 %628  ;;  %v653_v46 = vsel %vm652_vm15, %v643_v56, %v645_v59 }
 0x19c   : > { %v638_v25 = vsel %vm623_vm14, %v629_v15, %v631_v10 }
 0x19d   : > { %v798_v61 = vsel %vm729_vm9, %v638_v25, %v653_v46 }
 0x19e   : > { %v662_v23 = vpop.permute.xlu1 %661 }
 0x19f   : > { %v660_v20 = vpop.permute.xlu0 %659 }
 0x1a0   : > { %v668_v44 = vsel %vm652_vm15, %v660_v20, %v662_v23 }
 0x1a2   : > { %v622_v5 = vpop.permute.xlu1 %621 }
 0x1a3   : > { %v620_v37 = vpop.permute.xlu0 %619 }
 0x1a4   : > { %v626_v50 = vsel %vm623_vm14, %v3349_v58, %v620_v37  ;;  %v627_v38 = vsel %vm623_vm14, %v620_v37, %v622_v5  ;;  %v654_v58 = vsel %vm652_vm15, %v645_v59, %v3400_v33 }
 0x1a5   : > { %v794_v31 = vsel %vm751_vm12, %v783_v27, %v627_v38  ;;  %v791_v53 = vsel %vm751_vm12, %v781_v11, %v626_v50  ;;  %v801_v24 = vsel %vm729_vm9, %v639_v34, %v654_v58 }
 0x1a6   : > { %1381 = vmatprep.subr.bf16.mxu1 %v794_v31  ;;  %v674_v32 = vpop.permute.xlu1 %673  ;;  %v811_v17 = vsel %vm742_vm11, %v801_v24, %v668_v44  ;;  %v3476_v31 = vld [vmem:[%s3665_s1] sm:$0xff]  }
 0x1a7   : > { %v658_v22 = vpop.permute.xlu0 %657  ;;  %1382 = vmatpush1.bf16.msra.mxu1 %v791_v53 }
 0x1a8   : > { %v667_v47 = vsel %vm652_vm15, %v658_v22, %v660_v20  ;;  %v3803_v22 = vmov 0  }
 0x1a9   : > { %v809_v39 = vsel %vm742_vm11, %v798_v61, %v667_v47 }
 0x1aa   : > { %v672_v7 = vpop.permute.xlu1 %671 }
 0x1ab   : > { %v676_v0 = vpop.permute.xlu0 %675  ;;  %v682_v21 = vsel %vm681_vm0, %v672_v7, %v674_v32  ;;  %v3489_v7 = vld [vmem:[%s3665_s1 + $0x8] sm:$0xff]  }
 0x1ac   : > { %v683_v36 = vsel %vm681_vm0, %v674_v32, %v676_v0  ;;  %v817_v51 = vsel %vm751_vm12, %v809_v39, %v682_v21 }
 0x1ad   : > { %v820_v2 = vsel %vm751_vm12, %v811_v17, %v683_v36 }
 0x1ae   : > { %1330 = vmatprep.subr.bf16.mxu0 %v820_v2  ;;  %v637_v60 = vpop.permute.xlu1 %636 }
 0x1af   : > { %v635_v14 = vpop.permute.xlu0 %634  ;;  %1331 = vmatpush1.bf16.msra.mxu0 %v817_v51 }
 0x1b0   : > { %v640_v18 = vsel %vm623_vm14, %v3393_v28, %v635_v14  ;;  %v641_v19 = vsel %vm623_vm14, %v635_v14, %v637_v60 }
 0x1b2   : > { %v651_v42 = vpop.permute.xlu1 %650 }
 0x1b3   : > { %v649_v43 = vpop.permute.xlu0 %648 }
 0x1b4   : > { %v655_v62 = vsel %vm652_vm15, %v3400_v33, %v649_v43  ;;  %v656_v63 = vsel %vm652_vm15, %v649_v43, %v651_v42 }
 0x1b5   : > { %v804_v59 = vsel %vm729_vm9, %v640_v18, %v655_v62  ;;  %v807_v45 = vsel %vm729_vm9, %v641_v19, %v656_v63 }
 0x1b6   : > { %v666_v1 = vpop.permute.xlu1 %665 }
 0x1b7   : > { %v664_v49 = vpop.permute.xlu0 %663 }
 0x1b8   : > { %v669_v6 = vsel %vm652_vm15, %v662_v23, %v664_v49  ;;  %v670_v10 = vsel %vm652_vm15, %v664_v49, %v666_v1 }
 0x1b9   : > { %v815_v55 = vsel %vm742_vm11, %v807_v45, %v670_v10  ;;  %v813_v56 = vsel %vm742_vm11, %v804_v59, %v669_v6 }
 0x1ba   : > { %v689_v35 = vpop.permute.xlu1 %688 }
 0x1bb   : > { %v687_v30 = vpop.permute.xlu0 %686 }
 0x1bc   : > { %v696_v12 = vsel %vm681_vm0, %v687_v30, %v689_v35 }
 0x1be   : > { %v701_v40 = vpop.permute.xlu1 %700 }
 0x1bf   : > { %v691_v13 = vpop.permute.xlu0 %690 }
 0x1c0   : > { %v697_v5 = vsel %vm681_vm0, %v689_v35, %v691_v13 }
 0x1c2   : > { %v705_v54 = vpop.permute.xlu1 %704 }
 0x1c3   : > { %v703_v16 = vpop.permute.xlu0 %702 }
 0x1c4   : > { %v711_v20 = vsel %vm710_vm1, %v701_v40, %v703_v16  ;;  %v712_v9 = vsel %vm710_vm1, %v703_v16, %v705_v54 }
 0x1c5   : > { %v830_v29 = vsel %vm729_vm9, %v696_v12, %v711_v20  ;;  %v833_v37 = vsel %vm729_vm9, %v697_v5, %v712_v9 }
 0x1c6   : > { %v680_v57 = vpop.permute.xlu1 %679 }
 0x1c7   : > { %v678_v41 = vpop.permute.xlu0 %677 }
 0x1c8   : > { %v684_v48 = vsel %vm681_vm0, %v676_v0, %v678_v41  ;;  %v685_v33 = vsel %vm681_vm0, %v678_v41, %v680_v57 }
 0x1c9   : > { %v826_v15 = vsel %vm751_vm12, %v815_v55, %v685_v33  ;;  %v823_v28 = vsel %vm751_vm12, %v813_v56, %v684_v48 }
 0x1ca   : > { %1383 = vmatprep.subr.bf16.mxu1 %v826_v15  ;;  %v718_v23 = vpop.permute.xlu1 %717 }
 0x1cb   : > { %v716_v8 = vpop.permute.xlu0 %715  ;;  %1384 = vmatpush1.bf16.msra.mxu1 %v823_v28 }
 0x1cc   : > { %v725_v3 = vsel %vm710_vm1, %v716_v8, %v718_v23 }
 0x1cd   : > { %v841_v52 = vsel %vm742_vm11, %v830_v29, %v725_v3 }
 0x1ce   : > { %v693_v26 = vpop.permute.xlu1 %692  ;;  %v849_v27 = vsel %vm751_vm12, %v841_v52, 0 }
 0x1cf   : > { %v720_v4 = vpop.permute.xlu0 %719  ;;  %v698_v47 = vsel %vm681_vm0, %v691_v13, %v693_v26 }
 0x1d0   : > { %v726_v50 = vsel %vm710_vm1, %v718_v23, %v720_v4 }
 0x1d1   : > { %v843_v38 = vsel %vm742_vm11, %v833_v37, %v726_v50 }
 0x1d2   : > { %1940 = vmatprep.subr.msk.bf16.mxu0 %vm751_vm12, %v843_v38  ;;  %v707_v11 = vpop.permute.xlu1 %706 }
 0x1d3   : > { %v695_v53 = vpop.permute.xlu0 %694  ;;  %1333 = vmatpush1.bf16.msra.mxu0 %v849_v27  ;;  %v713_v25 = vsel %vm710_vm1, %v705_v54, %v707_v11 }
 0x1d4   : > { %v836_v34 = vsel %vm729_vm9, %v698_v47, %v713_v25  ;;  %v699_v24 = vsel %vm681_vm0, %v693_v26, %v695_v53 }
 0x1d6   : > { %v722_v32 = vpop.permute.xlu1 %721  ;;  %1941 = vmatmul.mubr.msk.bf16.vlgmr.msra.gmra.mrb[0].mxu0 %vm1319_vm2, %v3476_v31 }
 0x1d7   : > { %v709_v46 = vpop.permute.xlu0 %708  ;;  %1368 = vmatprep.mubr.bf16.mxu0 %v3803_v22  ;;  %v727_v58 = vsel %vm710_vm1, %v720_v4, %v722_v32 }
 0x1d8   : > { %v714_v44 = vsel %vm710_vm1, %v707_v11, %v709_v46  ;;  %v845_v21 = vsel %vm742_vm11, %v836_v34, %v727_v58 }
 0x1d9   : > { %v839_v39 = vsel %vm729_vm9, %v699_v24, %v714_v44  ;;  %v853_v51 = vsel %vm751_vm12, %v845_v21, 0 }
 0x1da   : > { %v1212_v61 = vpop.permute.xlu1 %1211 }
 0x1db   : > { %v724_v0 = vpop.permute.xlu0 %723 }
 0x1dc   : > { %v728_v36 = vsel %vm710_vm1, %v722_v32, %v724_v0 }
 0x1dd   : > { %v847_v17 = vsel %vm742_vm11, %v839_v39, %v728_v36 }
 0x1de   : > { %1943 = vmatprep.subr.msk.bf16.mxu1 %vm751_vm12, %v847_v17  ;;  %v1210_v2 = vpop.permute.xlu1 %1209  ;;  %1942 = vmatmul.mubr.msk.bf16.gmra.mrb[4].mxu0 %vm1319_vm2, %v3489_v7 }
 0x1df   : > { %v1214_v60 = vpop.permute.xlu0 %1213  ;;  %1386 = vmatpush1.bf16.msra.mxu1 %v853_v51  ;;  %v1249_v14 = vsel %vm521_vm8, %v1210_v2, %v1212_v61  ;;  %1464 = vmatprep.mubr.bf16.mxu0 %v3803_v22 }
 0x1e0   : > { %v1250_v42 = vsel %vm521_vm8, %v1212_v61, %v1214_v60 }
 0x1e1   : > { %1432 = vmatprep.subr.bf16.mxu0 %v1250_v42 }
 0x1e2   : > { %1433 = vmatpush1.bf16.msra.mxu0 %v1249_v14  ;;  %v1218_v43 = vpop.permute.xlu1 %1217  ;;  %1944 = vmatmul.mubr.msk.bf16.vlgmr.msra.gmra.mrb[0].mxu1 %vm1319_vm2, %v3476_v31 }
 0x1e3   : > { %v1216_v1 = vpop.permute.xlu0 %1215  ;;  %1421 = vmatprep.mubr.bf16.mxu1 %v3803_v22 }
 0x1e4   : > { %v1251_v49 = vsel %vm521_vm8, %v1214_v60, %v1216_v1  ;;  %v1252_v35 = vsel %vm521_vm8, %v1216_v1, %v1218_v43 }
 0x1e5   : > { %1485 = vmatprep.subr.bf16.mxu1 %v1252_v35 }
 0x1e6   : > { %1486 = vmatpush1.bf16.msra.mxu1 %v1251_v49  ;;  %v1224_v30 = vpop.permute.xlu1 %1223 }
 0x1e7   : > { %v1222_v40 = vpop.permute.xlu0 %1221 }
 0x1e8   : > { %v1254_v13 = vsel %vm521_vm8, %v1222_v40, %v1224_v30 }
 0x1e9   : > { %1434 = vmatprep.subr.bf16.mxu0 %v1254_v13 }
 0x1ea   : > { %v1226_v54 = vpop.permute.xlu1 %1225  ;;  %1945 = vmatmul.mubr.msk.bf16.gmra.mrb[4].mxu1 %vm1319_vm2, %v3489_v7 }
 0x1eb   : > { %v1220_v16 = vpop.permute.xlu0 %1219  ;;  %1517 = vmatprep.mubr.bf16.mxu1 %v3803_v22  ;;  %v1255_v18 = vsel %vm521_vm8, %v1224_v30, %v1226_v54 }
 0x1ec   : > { %v1253_v62 = vsel %vm521_vm8, %v1220_v16, %v1222_v40 }
 0x1ed   : > { %1435 = vmatpush1.bf16.msra.mxu0 %v1253_v62 }
 0x1ee   : > { %v1232_v63 = vpop.permute.xlu1 %1231 }
 0x1ef   : > { %v1228_v6 = vpop.permute.xlu0 %1227 }
 0x1f0   : > { %v1256_v10 = vsel %vm521_vm8, %v1226_v54, %v1228_v6 }
 0x1f1   : > { %1487 = vmatprep.subr.bf16.mxu1 %v1256_v10 }
 0x1f2   : > { %1488 = vmatpush1.bf16.msra.mxu1 %v1255_v18  ;;  %v1230_v19 = vpop.permute.xlu1 %1229 }
 0x1f3   : > { %v1234_v57 = vpop.permute.xlu0 %1233  ;;  %v1257_v59 = vsel %vm521_vm8, %v1230_v19, %v1232_v63 }
 0x1f4   : > { %v1258_v45 = vsel %vm521_vm8, %v1232_v63, %v1234_v57 }
 0x1f5   : > { %1436 = vmatprep.subr.bf16.mxu0 %v1258_v45 }
 0x1f6   : > { %1437 = vmatpush1.bf16.msra.mxu0 %v1257_v59  ;;  %v1238_v41 = vpop.permute.xlu1 %1237 }
 0x1f7   : > { %v1236_v48 = vpop.permute.xlu0 %1235 }
 0x1f8   : > { %v1259_v33 = vsel %vm521_vm8, %v1234_v57, %v1236_v48  ;;  %v1260_v55 = vsel %vm521_vm8, %v1236_v48, %v1238_v41 }
 0x1f9   : > { %1489 = vmatprep.subr.bf16.mxu1 %v1260_v55 }
 0x1fa   : > { %1490 = vmatpush1.bf16.msra.mxu1 %v1259_v33  ;;  %v1244_v56 = vpop.permute.xlu1 %1243 }
 0x1fb   : > { %v1242_v15 = vpop.permute.xlu0 %1241 }
 0x1fc   : > { %v1262_v28 = vsel %vm521_vm8, %v1242_v15, %v1244_v56 }
 0x1fd   : > { %1438 = vmatprep.subr.bf16.mxu0 %v1262_v28 }
 0x1fe   : > { %v1246_v8 = vpop.permute.xlu1 %1245 }
 0x1ff   : > { %v1240_v23 = vpop.permute.xlu0 %1239  ;;  %v1263_v9 = vsel %vm521_vm8, %v1244_v56, %v1246_v8 }
 0x200   : > { %v1261_v20 = vsel %vm521_vm8, %v1240_v23, %v1242_v15 }
 0x201   : > { %1439 = vmatpush1.bf16.msra.mxu0 %v1261_v20 }
 0x203   : > { %v1248_v3 = vpop.permute.xlu0 %1247 }
 0x204   : > { %1946 = vmatmul.mubr.msk.bf16.vlgmr.msra.gmra.mrb[8].mxu0 %vm1319_vm2, %v3476_v31  ;;  %v1264_v12 = vsel %vm521_vm8, %v1246_v8, %v1248_v3 }
 0x205   : > { %1491 = vmatprep.subr.bf16.mxu1 %v1264_v12  ;;  %1474 = vmatprep.mubr.bf16.mxu0 %v3803_v22 }
 0x206   : > { %1492 = vmatpush1.bf16.msra.mxu1 %v1263_v9 }
 0x209   : > { %1948 = vmatmul.mubr.msk.bf16.vlgmr.msra.gmra.mrb[8].mxu1 %vm1319_vm2, %v3476_v31 }
 0x20a   : > { %1527 = vmatprep.mubr.bf16.mxu1 %v3803_v22 }
 0x20c   : > { %1947 = vmatmul.mubr.msk.bf16.gmra.mrb[12].mxu0 %vm1319_vm2, %v3489_v7 }
 0x20f   : > { %v3533_v29 = vpop.permute.xlu1 %1291 }
 0x211   : > { %1949 = vmatmul.mubr.msk.bf16.gmra.mrb[12].mxu1 %vm1319_vm2, %v3489_v7 }
 0x213   : > { %v3540_v38 = vpop.permute.xlu1 %1301 }
 0x214   : > { %v3535_v5 = vpop.permute.xlu0 %1296 }
 0x217   : > { %v3548_v24 = vpop.permute.xlu1 %1306 }
 0x2a9   : > { %v1360_v26 = vpop.f32.mrb[0].mxu0 }
 0x2aa   : > { %v1362_v4 = vpop.f32.mrb[1].mxu0  ;;  %v1361_v52 = vadd.f32 %v1360_v26, %v3533_v29 }
 0x2ab   : > { %v1364_v37 = vpop.f32.mrb[2].mxu0  ;;  %v1363_v50 = vadd.f32 %v1362_v4, %v3533_v29 }
 0x2ac   : > { %v1365_v27 = vadd.f32 %v1364_v37, %v3535_v5  ;;  %v1366_v11 = vpop.f32.mrb[3].mxu0  ;;  %v1687_v31 = vmul.f32 %v1361_v52, %v1361_v52 }
 0x2ad   : > { %v1367_v53 = vadd.f32 %v1366_v11, %v3535_v5  ;;  %v1980_v32 = vpack.c.bf16 %v1363_v50, %v1361_v52  ;;  %v1651_v25 = vadd.f32 %v1363_v50, %v1361_v52  ;;  %v1688_v46 = vmul.f32 %v1363_v50, %v1363_v50 }
 0x2ae   : > { %v1695_v22 = vmul.f32 %v1365_v27, %v1365_v27 }
 0x2af   : > { %v1982_v58 = vpack.c.bf16 %v1367_v53, %v1365_v27  ;;  %v1660_v47 = vadd.f32 %v1367_v53, %v1365_v27  ;;  %v1696_v44 = vmul.f32 %v1367_v53, %v1367_v53  ;;  %1586 = vst [vmem:[%s3544_s28] sm:$0xff] %v1980_v32  ;;  %v1719_v34 = vadd.f32 %v1688_v46, %v1687_v31 }
 0x2b1   : > { %1588 = vst [vmem:[%s3544_s28 + $0x10] sm:$0xff] %v1982_v58  ;;  %v1728_v61 = vadd.f32 %v1696_v44, %v1695_v22  ;;  %v1370_v7 = vpop.f32.mrb[4].mxu0 }
 0x2b2   : > { %v1371_v0 = vadd.f32 %v1370_v7, %v3540_v38  ;;  %v1372_v21 = vpop.f32.mrb[5].mxu0 }
 0x2b3   : > { %v1373_v39 = vadd.f32 %v1372_v21, %v3540_v38  ;;  %v1374_v36 = vpop.f32.mrb[6].mxu0 }
 0x2b4   : > { %v1703_v17 = vmul.f32 %v1371_v0, %v1371_v0  ;;  %v1376_v51 = vpop.f32.mrb[7].mxu0  ;;  %v1375_v2 = vadd.f32 %v1374_v36, %v3548_v24 }
 0x2b5   : > { %v1413_v60 = vpop.f32.mrb[0].mxu1  ;;  %v1984_v14 = vpack.c.bf16 %v1373_v39, %v1371_v0  ;;  %v1669_v42 = vadd.f32 %v1373_v39, %v1371_v0  ;;  %v1704_v43 = vmul.f32 %v1373_v39, %v1373_v39  ;;  %v1377_v1 = vadd.f32 %v1376_v51, %v3548_v24 }
 0x2b6   : > { %v1414_v49 = vadd.f32 %v1413_v60, %v3533_v29  ;;  %v1415_v35 = vpop.f32.mrb[1].mxu1  ;;  %v1711_v30 = vmul.f32 %v1375_v2, %v1375_v2 }
 0x2b7   : > { %v1416_v40 = vadd.f32 %v1415_v35, %v3533_v29  ;;  %v1417_v13 = vpop.f32.mrb[2].mxu1  ;;  %1590 = vst [vmem:[%s3544_s28 + $0x20] sm:$0xff] %v1984_v14  ;;  %v1737_v54 = vadd.f32 %v1704_v43, %v1703_v17  ;;  %v1986_v16 = vpack.c.bf16 %v1377_v1, %v1375_v2  ;;  %v1678_v62 = vadd.f32 %v1377_v1, %v1375_v2 }
 0x2b8   : > { %v1652_v63 = vadd.f32 %v1651_v25, %v1414_v49  ;;  %v1689_v6 = vmul.f32 %v1414_v49, %v1414_v49  ;;  %v1418_v10 = vadd.f32 %v1417_v13, %v3535_v5  ;;  %v1419_v18 = vpop.f32.mrb[3].mxu1  ;;  %v1712_v19 = vmul.f32 %v1377_v1, %v1377_v1 }
 0x2b9   : > { %v1981_v57 = vpack.c.bf16 %v1416_v40, %v1414_v49  ;;  %v1690_v59 = vmul.f32 %v1416_v40, %v1416_v40  ;;  %v1420_v45 = vadd.f32 %v1419_v18, %v3535_v5  ;;  %1592 = vst [vmem:[%s3544_s28 + $0x30] sm:$0xff] %v1986_v16 }
 0x2ba   : > { %v1720_v41 = vadd.f32 %v1719_v34, %v1689_v6  ;;  %v1653_v48 = vadd.f32 %v1652_v63, %v1416_v40  ;;  %v1661_v33 = vadd.f32 %v1660_v47, %v1418_v10  ;;  %v1697_v55 = vmul.f32 %v1418_v10, %v1418_v10 }
 0x2bb   : > { %1587 = vst [vmem:[%s3544_s28 + $0x8] sm:$0xff] %v1981_v57  ;;  %v1983_v56 = vpack.c.bf16 %v1420_v45, %v1418_v10  ;;  %v1698_v15 = vmul.f32 %v1420_v45, %v1420_v45  ;;  %v1746_v28 = vadd.f32 %v1712_v19, %v1711_v30 }
 0x2bc   : > { %v1721_v23 = vadd.f32 %v1720_v41, %v1690_v59  ;;  %v1729_v20 = vadd.f32 %v1728_v61, %v1697_v55  ;;  %v1662_v8 = vadd.f32 %v1661_v33, %v1420_v45 }
 0x2bd   : > { %1589 = vst [vmem:[%s3544_s28 + $0x18] sm:$0xff] %v1983_v56  ;;  %v1423_v3 = vpop.f32.mrb[4].mxu1 }
 0x2be   : > { %v1730_v12 = vadd.f32 %v1729_v20, %v1698_v15  ;;  %v1424_v9 = vadd.f32 %v1423_v3, %v3540_v38  ;;  %v1425_v26 = vpop.f32.mrb[5].mxu1 }
 0x2bf   : > { %v1426_v4 = vadd.f32 %v1425_v26, %v3540_v38  ;;  %v1427_v52 = vpop.f32.mrb[6].mxu1 }
 0x2c0   : > { %v1670_v37 = vadd.f32 %v1669_v42, %v1424_v9  ;;  %v1705_v50 = vmul.f32 %v1424_v9, %v1424_v9  ;;  %v1428_v27 = vadd.f32 %v1427_v52, %v3548_v24  ;;  %v1429_v11 = vpop.f32.mrb[7].mxu1 }
 0x2c1   : > { %v1985_v31 = vpack.c.bf16 %v1426_v4, %v1424_v9  ;;  %v1706_v53 = vmul.f32 %v1426_v4, %v1426_v4  ;;  %v1430_v32 = vadd.f32 %v1429_v11, %v3548_v24 }
 0x2c2   : > { %v1738_v25 = vadd.f32 %v1737_v54, %v1705_v50  ;;  %v1671_v46 = vadd.f32 %v1670_v37, %v1426_v4  ;;  %v1679_v22 = vadd.f32 %v1678_v62, %v1428_v27  ;;  %v1713_v58 = vmul.f32 %v1428_v27, %v1428_v27 }
 0x2c3   : > { %1591 = vst [vmem:[%s3544_s28 + $0x28] sm:$0xff] %v1985_v31  ;;  %v1987_v47 = vpack.c.bf16 %v1430_v32, %v1428_v27  ;;  %v1714_v44 = vmul.f32 %v1430_v32, %v1430_v32 }
 0x2c4   : > { %v1739_v34 = vadd.f32 %v1738_v25, %v1706_v53  ;;  %v1747_v61 = vadd.f32 %v1746_v28, %v1713_v58  ;;  %v1680_v7 = vadd.f32 %v1679_v22, %v1430_v32 }
 0x2c5   : > { %1593 = vst [vmem:[%s3544_s28 + $0x38] sm:$0xff] %v1987_v47 }
 0x2c6   : > { %v3568_v0 = vadd.f32 %v1747_v61, %v1714_v44 }
 0x2d7   : > { %v1466_v21 = vpop.f32.mrb[8].mxu0 }
 0x2d8   : > { %v1467_v39 = vadd.f32 %v1466_v21, %v3533_v29  ;;  %v1468_v36 = vpop.f32.mrb[9].mxu0 }
 0x2d9   : > { %v1469_v17 = vadd.f32 %v1468_v36, %v3533_v29  ;;  %v1470_v51 = vpop.f32.mrb[10].mxu0 }
 0x2da   : > { %v1654_v2 = vadd.f32 %v1653_v48, %v1467_v39  ;;  %v1691_v60 = vmul.f32 %v1467_v39, %v1467_v39  ;;  %v1471_v14 = vadd.f32 %v1470_v51, %v3535_v5  ;;  %v1472_v42 = vpop.f32.mrb[11].mxu0 }
 0x2db   : > { %v1988_v43 = vpack.c.bf16 %v1469_v17, %v1467_v39  ;;  %v1692_v1 = vmul.f32 %v1469_v17, %v1469_v17  ;;  %v1473_v49 = vadd.f32 %v1472_v42, %v3535_v5 }
 0x2dc   : > { %v1722_v35 = vadd.f32 %v1721_v23, %v1691_v60  ;;  %v1655_v30 = vadd.f32 %v1654_v2, %v1469_v17  ;;  %v1663_v40 = vadd.f32 %v1662_v8, %v1471_v14  ;;  %v1699_v13 = vmul.f32 %v1471_v14, %v1471_v14  ;;  %v1519_v54 = vpop.f32.mrb[8].mxu1 }
 0x2dd   : > { %1966 = vst [vmem:[%s3544_s28 + $0x40] sm:$0xff] %v1988_v43  ;;  %v1990_v16 = vpack.c.bf16 %v1473_v49, %v1471_v14  ;;  %v1700_v62 = vmul.f32 %v1473_v49, %v1473_v49  ;;  %v1520_v63 = vadd.f32 %v1519_v54, %v3533_v29  ;;  %v1521_v6 = vpop.f32.mrb[9].mxu1 }
 0x2de   : > { %v1723_v10 = vadd.f32 %v1722_v35, %v1692_v1  ;;  %v1731_v18 = vadd.f32 %v1730_v12, %v1699_v13  ;;  %v1664_v19 = vadd.f32 %v1663_v40, %v1473_v49  ;;  %v1522_v57 = vadd.f32 %v1521_v6, %v3533_v29  ;;  %v1523_v59 = vpop.f32.mrb[10].mxu1 }
 0x2df   : > { %1968 = vst [vmem:[%s3544_s28 + $0x50] sm:$0xff] %v1990_v16  ;;  %v1656_v45 = vadd.f32 %v1655_v30, %v1520_v63  ;;  %v1693_v41 = vmul.f32 %v1520_v63, %v1520_v63  ;;  %v1524_v48 = vadd.f32 %v1523_v59, %v3535_v5  ;;  %v1476_v33 = vpop.f32.mrb[12].mxu0  ;;  %v1525_v55 = vpop.f32.mrb[11].mxu1 }
 0x2e0   : > { %v1732_v56 = vadd.f32 %v1731_v18, %v1700_v62  ;;  %v1989_v15 = vpack.c.bf16 %v1522_v57, %v1520_v63  ;;  %v1694_v28 = vmul.f32 %v1522_v57, %v1522_v57  ;;  %v1477_v23 = vadd.f32 %v1476_v33, %v3540_v38  ;;  %v1478_v20 = vpop.f32.mrb[13].mxu0 }
 0x2e1   : > { %v1665_v8 = vadd.f32 %v1664_v19, %v1524_v48  ;;  %v1701_v3 = vmul.f32 %v1524_v48, %v1524_v48  ;;  %v1526_v12 = vadd.f32 %v1525_v55, %v3535_v5  ;;  %v1479_v29 = vadd.f32 %v1478_v20, %v3540_v38  ;;  %v1480_v9 = vpop.f32.mrb[14].mxu0 }
 0x2e2   : > { %1967 = vst [vmem:[%s3544_s28 + $0x48] sm:$0xff] %v1989_v15  ;;  %v1672_v26 = vadd.f32 %v1671_v46, %v1477_v23  ;;  %v1707_v4 = vmul.f32 %v1477_v23, %v1477_v23  ;;  %v1481_v52 = vadd.f32 %v1480_v9, %v3548_v24  ;;  %v1482_v37 = vpop.f32.mrb[15].mxu0  ;;  %v1657_v50 = vadd.f32 %v1656_v45, %v1522_v57 }
 0x2e3   : > { %v1991_v27 = vpack.c.bf16 %v1526_v12, %v1524_v48  ;;  %v1702_v11 = vmul.f32 %v1526_v12, %v1526_v12  ;;  %v1992_v31 = vpack.c.bf16 %v1479_v29, %v1477_v23  ;;  %v1708_v53 = vmul.f32 %v1479_v29, %v1479_v29 }
 0x2e4   : > { %v1740_v32 = vadd.f32 %v1739_v34, %v1707_v4  ;;  %v1673_v25 = vadd.f32 %v1672_v26, %v1479_v29  ;;  %v1681_v22 = vadd.f32 %v1680_v7, %v1481_v52  ;;  %v1715_v5 = vmul.f32 %v1481_v52, %v1481_v52  ;;  %1658 = vadd.xlane.f32.xlu0 %v1657_v50  ;;  %v1529_v58 = vpop.f32.mrb[12].mxu1 }
 0x2e5   : > { %1969 = vst [vmem:[%s3544_s28 + $0x58] sm:$0xff] %v1991_v27  ;;  %1970 = vst [vmem:[%s3544_s28 + $0x60] sm:$0xff] %v1992_v31  ;;  %v1483_v46 = vadd.f32 %v1482_v37, %v3548_v24  ;;  %v1530_v47 = vadd.f32 %v1529_v58, %v3540_v38  ;;  %v1531_v44 = vpop.f32.mrb[13].mxu1  ;;  %v1666_v61 = vadd.f32 %v1665_v8, %v1526_v12 }
 0x2e6   : > { %v1733_v21 = vadd.f32 %v1732_v56, %v1701_v3  ;;  %v1741_v39 = vadd.f32 %v1740_v32, %v1708_v53  ;;  %v1749_v36 = vadd.f32 %v3568_v0, %v1715_v5  ;;  %v1532_v34 = vadd.f32 %v1531_v44, %v3540_v38  ;;  %v1533_v17 = vpop.f32.mrb[14].mxu1 }
 0x2e7   : > { %v1724_v7 = vadd.f32 %v1723_v10, %v1693_v41  ;;  %v1994_v51 = vpack.c.bf16 %v1483_v46, %v1481_v52  ;;  %v1682_v2 = vadd.f32 %v1681_v22, %v1483_v46  ;;  %v1716_v60 = vmul.f32 %v1483_v46, %v1483_v46  ;;  %1667 = vadd.xlane.f32.xlu1 %v1666_v61  ;;  %v1535_v42 = vpop.f32.mrb[15].mxu1 }
 0x2e8   : > { %v1674_v14 = vadd.f32 %v1673_v25, %v1530_v47  ;;  %v1709_v43 = vmul.f32 %v1530_v47, %v1530_v47  ;;  %v1993_v1 = vpack.c.bf16 %v1532_v34, %v1530_v47  ;;  %v1710_v49 = vmul.f32 %v1532_v34, %v1532_v34 }
 0x2e9   : > { %v1534_v35 = vadd.f32 %v1533_v17, %v3548_v24  ;;  %1972 = vst [vmem:[%s3544_s28 + $0x70] sm:$0xff] %v1994_v51  ;;  %v1750_v30 = vadd.f32 %v1749_v36, %v1716_v60  ;;  %v1536_v0 = vadd.f32 %v1535_v42, %v3548_v24  ;;  %v1734_v38 = vadd.f32 %v1733_v21, %v1702_v11 }
 0x2ea   : > { %v1725_v40 = vadd.f32 %v1724_v7, %v1694_v28  ;;  %1971 = vst [vmem:[%s3544_s28 + $0x68] sm:$0xff] %v1993_v1  ;;  %v1675_v16 = vadd.f32 %v1674_v14, %v1532_v34  ;;  %v1742_v62 = vadd.f32 %v1741_v39, %v1709_v43 }
 0x2eb   : > { %v1683_v13 = vadd.f32 %v1682_v2, %v1534_v35  ;;  %v1717_v54 = vmul.f32 %v1534_v35, %v1534_v35  ;;  %v1995_v63 = vpack.c.bf16 %v1536_v0, %v1534_v35  ;;  %v1718_v6 = vmul.f32 %v1536_v0, %v1536_v0  ;;  %1735 = vadd.xlane.f32.xlu0 %v1734_v38 }
 0x2ec   : > { %1726 = vadd.xlane.f32.xlu1 %v1725_v40  ;;  %v1743_v10 = vadd.f32 %v1742_v62, %v1710_v49 }
 0x2ed   : > { %v1684_v18 = vadd.f32 %v1683_v13, %v1536_v0  ;;  %v1751_v19 = vadd.f32 %v1750_v30, %v1717_v54  ;;  %1973 = vst [vmem:[%s3544_s28 + $0x78] sm:$0xff] %v1995_v63 }
 0x2ef   : > { %v1752_v24 = vadd.f32 %v1751_v19, %v1718_v6  ;;  %1676 = vadd.xlane.f32.xlu0 %v1675_v16 }
 0x2f0   : > { %1744 = vadd.xlane.f32.xlu1 %v1743_v10 }
 0x2f3   : > { %1685 = vadd.xlane.f32.xlu0 %v1684_v18 }
 0x2f7   : > { %1753 = vadd.xlane.f32.xlu0 %v1752_v24 }
 0x2f8   : > { %2137 = shalt.err (!%p2134_p5)
}
 0x2f9   : > { %s2138_s28 = scalar_lea.hbm %s3600_s14, 2048  ;;  %s2142_s7 = scalar_lea.hbm %s3667_s3, 8192 }
 0x2fa   : > { %p2139_p7 = scmp.ne.s32.totalorder %s3600_s14, %s2138_s28  ;;  %p2143_p1 = scmp.lt.u32.totalorder %s3600_s14, %s3667_s3 }
 0x2fb   : > { %p2144_p2 = scmp.lt.u32.totalorder %s2142_s7, %s2138_s28  ;;  %p2146_p8 = scmp.lt.u32.totalorder %s2138_s28, %s3600_s14 }
 0x2fc   : > { %p2140_p10 = pnand %p2139_p7, %p3804_p9 }
 0x2fd   : > { %p2145_p4 = por %p2144_p2, %p2143_p1 }
 0x2fe   : > { %p2141_p11 = pneg %p2140_p10 }
 0x2ff   : > { %p2147_p12 = por %p2146_p8, %p2145_p4 }
 0x301   : > { %p2148_p0 = pnand %p2147_p12, %p2141_p11 }
 0x303   : > { %2151 = shalt.err (!%p2148_p0)
}
 0x304   : > { %s2235_s12 = smov 256   ;;  %s2236_s13 = smov 512   ;;  %vm1755_vm3 = vcmask 7168   ;;  %vm1760_vm4 = vcmask 15360  }
 0x305   : > { %s2237_s24 = smov 16   ;;  %p247_p6 = scmp.lt.s32.totalorder %s2210_s19, 1 }
 0x306   : > { %2002 = dma.vmem_to_hbm [thread:$0]  (%p3804_p9), %s3603_s26, 2048, %s3600_s14, %s1766_s30, %s2235_s12, %s2236_s13, %s2237_s24  }
 0x307   : > { %p249_p13 = scmp.lt.s32.totalorder %s2206_s18, 1  ;;  %s3822_s19 = smov (!%p247_p6, %s2210_s19), 1 }
 0x308   : > { %s1932_s23 = sshll.u32 %s3822_s19, 3 }
 0x309   : > { %s3824_s18 = smov (!%p249_p13, %s2206_s18), 1 }
 0x30a   : > { %s1931_s29 = sshll.u32 %s3824_s18, 2 }
 0x30b   : > { %s253_s28 = sadd.s32 %s1932_s23, %s1931_s29 }
 0x30c   : > { %s1933_s9 = sshll.u32 %s253_s28, 3 }
 0x30d   : > { %s255_s27 = scalar_lea.vmem %s3668_s4, %s1933_s9 }
 0x371   : > { %v1659_v57 = vpop.xlane.xlu0 %1658 }
 0x374   : > { %v1668_v59 = vpop.xlane.xlu1 %1667 }
 0x378   : > { %v1736_v45 = vpop.xlane.xlu0 %1735 }
 0x379   : > { %v1727_v41 = vpop.xlane.xlu1 %1726  ;;  %v1757_v48 = vsel %vm1755_vm3, %v1668_v59, %v1736_v45 }
 0x37a   : > { %v1756_v33 = vsel %vm1755_vm3, %v1659_v57, %v1727_v41  ;;  %1762 = vst.msk [vmem:[%s255_s27 + $0x8] sm:$0xff] %vm1760_vm4, %v1757_v48 }
 0x37b   : > { %1761 = vst.msk [vmem:[%s255_s27] sm:$0xff] %vm1760_vm4, %v1756_v33 }
 0x37c   : > { %v1677_v55 = vpop.xlane.xlu0 %1676 }
 0x37d   : > { %v1745_v56 = vpop.xlane.xlu1 %1744 }
 0x37e   : > { %v1758_v15 = vsel %vm1755_vm3, %v1677_v55, %v1745_v56 }
 0x37f   : > { %1763 = vst.msk [vmem:[%s255_s27 + $0x10] sm:$0xff] %vm1760_vm4, %v1758_v15 }
 0x380   : > { %v1686_v28 = vpop.xlane.xlu0 %1685 }
 0x384   : > { %v1754_v23 = vpop.xlane.xlu0 %1753 }
 0x385   : > { %v1759_v20 = vsel %vm1755_vm3, %v1686_v28, %v1754_v23 }
 0x386   : > { %1764 = vst.msk [vmem:[%s255_s27 + $0x18] sm:$0xff] %vm1760_vm4, %v1759_v20 }
 0x387 PF: > { %p2013_p9 = scmp.ge.s32.totalorder %s2222_s22, 2  ;;  %s1808_s18 = sand.u32 1, %s2194_s15  }
 0x388   : > { %p3805_p3 = scmp.ne.s32.totalorder %s3707_s8, 0  ;;  %s1809_s19 = scalar_lea.sflag [#allocation4], %s1808_s18 }
 0x38a   : > { %p2009_p5 = pnand %p2013_p9, %p3805_p3 }
 0x38c   : > { %2189 = dma.done.wait (!%p2009_p5), %s1809_s19, 2048  }
 0x38d   : > { %2191 = vsyncadd (!%p2009_p5), %s1809_s19, 4294965248  ;;  %s21_s22 = sadd.s32 1, %s2222_s22   ;;  %s3806_s5 = sld [smem:[#allocation8_spill]] }
 0x38e   : > { %p18_p7 = scmp.ge.s32.totalorder %s21_s22, 6   ;;  %s3807_s25 = sld [smem:[#allocation9_spill]] }
 0x38f   : > { %s3808_s15 = smov %s2198_s16  ;;  %s3809_s16 = smov %s2202_s17 }
 0x390   : > { %s3810_s17 = smov %s2341_s10  ;;  %s3811_s18 = smov %s2214_s20 }
 0x391   : > { %s3812_s19 = smov %s2218_s21  ;;  %20 = sbr.rel (!%p18_p7) target bundleno = 7 (0x7), region = 90 }
 0x393   : > { %s3813_s20 = smov %s3806_s5 }
 0x394   : > { %s3814_s21 = smov %s3807_s25 }
 0x398   :  { %1826 = vsyncpa [#allocation3], 1 }
 0x399   :  { %1828 = vsyncpa [#allocation3 + $0x1], 1 }
 0x39a   :  { %1829 = vsyncpa [#allocation4], 1 }
 0x39b   :  { %1831 = vsyncpa [#allocation4 + $0x1], 1 }

</bundles_post_ra>
